<compile_context>
chip_gen: v6e
topology: v6e:2x2x1
jax: 0.10.0
libtpu: 0.0.40
codegen_flags: <defaults>
</compile_context>

<pallas_src>
import jax
import jax.numpy as jnp
from jax import lax
from jax.experimental import pallas as pl
from jax.experimental.pallas import tpu as pltpu

EPS = 1e-5
P_DROP = 0.1
KEEP_SCALE = 1.0 / (1.0 - P_DROP)
# drop iff hash < DROP_THR, i.e. P(drop) = DROP_THR / 2^32
DROP_THR = int(P_DROP * (1 << 32))  # 429496729


def _pick_row_tile(rows, hw, bytes_per_elem=4, target_bytes=1 << 20):
    """Largest multiple of 8 that divides `rows` with a tile <= target_bytes."""
    best = min(8, rows)
    t = 8
    while t <= rows:
        if rows % t == 0 and t * hw * bytes_per_elem <= target_bytes:
            best = t
        t += 8
    return best


def _stats_kernel(x_ref, sum_ref, sq_ref):
    # x_ref: (tm, HW)  ->  per-row sum / sum-of-squares, shape (tm, 1)
    x = x_ref[...].astype(jnp.float32)
    sum_ref[...] = jnp.sum(x, axis=1, keepdims=True)
    sq_ref[...] = jnp.sum(x * x, axis=1, keepdims=True)


def _apply_kernel(seed_ref, x_ref, scale_ref, shift_ref, o_ref):
    # x_ref: (tm, HW), scale/shift: (tm, 1) per-row folded affine params.
    x = x_ref[...].astype(jnp.float32)
    y = x * scale_ref[...] + shift_ref[...]        # folded BN affine
    y = jnp.maximum(y, 0.0)                        # ReLU

    # ---- Dropout(p=0.1): integer-domain keep test on hashed element index ----
    tm, hw = y.shape
    rows = lax.broadcasted_iota(jnp.int32, (tm, hw), 0).astype(jnp.uint32)
    cols = lax.broadcasted_iota(jnp.int32, (tm, hw), 1).astype(jnp.uint32)
    base = pl.program_id(0).astype(jnp.uint32) * jnp.uint32(tm * hw)
    idx = base + rows * jnp.uint32(hw) + cols      # globally unique per element
    seed = seed_ref[0].astype(jnp.uint32)
    h = idx ^ (seed * jnp.uint32(0x9E3779B1))
    h = h ^ (h >> 16)
    h = h * jnp.uint32(0x85EBCA6B)
    h = h ^ (h >> 13)
    h = h * jnp.uint32(0xC2B2AE35)
    h = h ^ (h >> 16)
    keep = h >= jnp.uint32(DROP_THR)
    y = jnp.where(keep, y * KEEP_SCALE, 0.0)

    o_ref[...] = y.astype(o_ref.dtype)


def bn_relu_dropout(x_nchw, gamma, beta, seed):
    N, C, H, W = x_nchw.shape
    HW = H * W
    R = N * C
    x2d = x_nchw.reshape(R, HW)                    # free view, no transpose

    tm = _pick_row_tile(R, HW)
    nt = R // tm

    cp = pltpu.CompilerParams(
        dimension_semantics=("parallel",),
        vmem_limit_bytes=32 * 1024 * 1024,
    )

    # ---- Pass 1: per-row sum and sum(x^2), tiled over rows -------------------
    row_sum, row_sq = pl.pallas_call(
        _stats_kernel,
        out_shape=(jax.ShapeDtypeStruct((R, 1), jnp.float32),
                   jax.ShapeDtypeStruct((R, 1), jnp.float32)),
        grid=(nt,),
        in_specs=[pl.BlockSpec((tm, HW), lambda i: (i, 0))],
        out_specs=(pl.BlockSpec((tm, 1), lambda i: (i, 0)),
                   pl.BlockSpec((tm, 1), lambda i: (i, 0))),
        compiler_params=cp,
    )(x2d)

    # ---- Tiny per-channel combine + folded affine (C-sized, negligible) ------
    cnt = jnp.float32(N * HW)
    ch_sum = row_sum.reshape(N, C).sum(axis=0)
    ch_sq = row_sq.reshape(N, C).sum(axis=0)
    mean = ch_sum / cnt
    var = jnp.maximum(ch_sq / cnt - mean * mean, 0.0)   # biased (training) var
    inv_std = lax.rsqrt(var + EPS)
    scale = gamma.astype(jnp.float32) * inv_std          # (C,)
    shift = beta.astype(jnp.float32) - mean * scale      # (C,)
    scale_rows = jnp.tile(scale, N).reshape(R, 1)
    shift_rows = jnp.tile(shift, N).reshape(R, 1)

    # ---- Pass 2: normalize + ReLU + dropout, tiled & parallel over rows ------
    out2d = pl.pallas_call(
        _apply_kernel,
        out_shape=jax.ShapeDtypeStruct((R, HW), x_nchw.dtype),
        grid_spec=pltpu.PrefetchScalarGridSpec(
            num_scalar_prefetch=1,
            grid=(nt,),
            in_specs=[pl.BlockSpec((tm, HW), lambda i, seed: (i, 0)),
                      pl.BlockSpec((tm, 1), lambda i, seed: (i, 0)),
                      pl.BlockSpec((tm, 1), lambda i, seed: (i, 0))],
            out_specs=pl.BlockSpec((tm, HW), lambda i, seed: (i, 0)),
        ),
        compiler_params=cp,
    )(jnp.array([seed], dtype=jnp.int32), x2d, scale_rows, shift_rows)

    return out2d.reshape(N, C, H, W)


if __name__ == "__main__":
    # Same shape as the original module's input: (1, 512, 28, 28).
    N, C, H, W = 1, 512, 28, 28
    key = jax.random.PRNGKey(0)
    x = jax.random.normal(key, (N, C, H, W), dtype=jnp.float32)

    # PyTorch BatchNorm2d init: weight = 1, bias = 0.
    gamma = jnp.ones((C,), dtype=jnp.float32)
    beta = jnp.zeros((C,), dtype=jnp.float32)

    out = bn_relu_dropout(x, gamma, beta, seed=1234)
    jax.block_until_ready(out)

    # Pure-JAX reference for BN(train stats) + ReLU; dropout checked
    # structurally (each element is 0 or ref/(1-p)).
    xf = x.astype(jnp.float32)
    mean = xf.mean(axis=(0, 2, 3), keepdims=True)
    var = ((xf - mean) ** 2).mean(axis=(0, 2, 3), keepdims=True)
    ref = jnp.maximum(
        (xf - mean) * lax.rsqrt(var + EPS) * gamma.reshape(1, C, 1, 1)
        + beta.reshape(1, C, 1, 1),
        0.0,
    )
    scaled = ref * KEEP_SCALE
    ok = (jnp.abs(out) <= 1e-6) | (
        jnp.abs(out - scaled) <= 1e-3 + 1e-3 * jnp.abs(scaled)
    )

    assert out.shape == (N, C, H, W)
    assert bool(jnp.all(out >= 0.0))          # ReLU + dropout -> non-negative
    assert bool(jnp.all(ok))                   # matches BN+ReLU up to drop mask
    pos = ref > 1e-6
    keep_rate = (jnp.where(pos, (out > 0).astype(jnp.float32), 0.0).sum()
                 / jnp.maximum(pos.sum(), 1))
    assert 0.85 < float(keep_rate) < 0.95      # ~ (1 - p) survivors
    print("KERNEL_OK")
</pallas_src>

<mosaic_0001>
module attributes {stable_mosaic.version = 11 : i64} {
  func.func @_stats_kernel(%arg0: i32, %arg1: memref<256x784xf32, #tpu.memory_space<vmem>>, %arg2: memref<256x1xf32, #tpu.memory_space<vmem>>, %arg3: memref<256x1xf32, #tpu.memory_space<vmem>>) attributes {dimension_semantics = [#tpu.dimension_semantics<parallel>], iteration_bounds = array<i64: 2>, scalar_prefetch = 0 : i64, scratch_operands = 0 : i64, tpu.core_type = #tpu.core_type<tc>, window_params = [{transform_indices = @transform_0, window_bounds = array<i64: 256, 784>}, {transform_indices = @transform_1, window_bounds = array<i64: 256, 1>}, {transform_indices = @transform_2, window_bounds = array<i64: 256, 1>}]} {
    %c0 = arith.constant 0 : index
    %c0_0 = arith.constant 0 : index
    %0 = vector.load %arg1[%c0, %c0_0] : memref<256x784xf32, #tpu.memory_space<vmem>>, vector<256x784xf32>
    %cst = arith.constant dense<0.000000e+00> : vector<256xf32>
    %1 = vector.multi_reduction <add>, %0, %cst [1] : vector<256x784xf32> to vector<256xf32>
    %2 = vector.shape_cast %1 : vector<256xf32> to vector<256x1xf32>
    %c0_1 = arith.constant 0 : index
    %c0_2 = arith.constant 0 : index
    %3 = vector.load %arg2[%c0_1, %c0_2] : memref<256x1xf32, #tpu.memory_space<vmem>>, vector<256x1xf32>
    tpu.vector_store %arg2[%c0_1, %c0_2], %2 {strides = array<i32>} : memref<256x1xf32, #tpu.memory_space<vmem>>, vector<256x1xf32>,
    %4 = arith.mulf %0, %0 : vector<256x784xf32>
    %cst_3 = arith.constant dense<0.000000e+00> : vector<256xf32>
    %5 = vector.multi_reduction <add>, %4, %cst_3 [1] : vector<256x784xf32> to vector<256xf32>
    %6 = vector.shape_cast %5 : vector<256xf32> to vector<256x1xf32>
    %c0_4 = arith.constant 0 : index
    %c0_5 = arith.constant 0 : index
    %7 = vector.load %arg3[%c0_4, %c0_5] : memref<256x1xf32, #tpu.memory_space<vmem>>, vector<256x1xf32>
    tpu.vector_store %arg3[%c0_4, %c0_5], %6 {strides = array<i32>} : memref<256x1xf32, #tpu.memory_space<vmem>>, vector<256x1xf32>,
    return
  }
  func.func @transform_0(%arg0: i32) -> (i32, i32) {
    %c0_i32 = arith.constant 0 : i32
    %c0_i32_0 = arith.constant 0 : i32
    return %arg0, %c0_i32 : i32, i32
  }
  func.func @transform_1(%arg0: i32) -> (i32, i32) {
    %c0_i32 = arith.constant 0 : i32
    %c0_i32_0 = arith.constant 0 : i32
    return %arg0, %c0_i32 : i32, i32
  }
  func.func @transform_2(%arg0: i32) -> (i32, i32) {
    %c0_i32 = arith.constant 0 : i32
    %c0_i32_0 = arith.constant 0 : i32
    return %arg0, %c0_i32 : i32, i32
  }
}

</mosaic_0001>

<bundles_post_ra>
// kernel: tpu_custom_call.1
= control target key start
LH: loop header
LB: loop body
LE: loop exit
PB: predicated region body
PF: predicated region fallthrough
CT: control target
= control target key end

     0   :  { %s1389_s9 = smov 0   ;;  %s2920_s0 = inlined_call_operand.vmem [shape: f32[512,784], index: 0, kind: input, shape index: {}]   ;;  %s2921_s1 = inlined_call_operand.vmem [shape: f32[512,1], index: 1, kind: output, shape index: {0}]   ;;  %s2922_s2 = inlined_call_operand.vmem [shape: f32[512,1], index: 2, kind: output, shape index: {1}]  }
   0x1 LB: > { %s1344_s10 = sadd.s32 4294967295, %s1372_s9   ;;  %p1348_p0 = scmp.ge.s32.totalorder %s1372_s9, 1  ;;  %s1372_s9 = sphi %s1389_s9, %s13_s9  }
   0x2   : > { %p117_p1 = scmp.lt.s32.totalorder %s1372_s9, 3 }
   0x4   : > { %p118_p2 = pnand %p1348_p0, %p117_p1 }
   0x6   : > { %121 = sbr.rel (%p118_p2) target bundleno = 353 (0x161), region = 24 }
   0xb   : > { %s1349_s11 = sshll.u32 %s1344_s10, 5  ;;  %vm393_vm0 = vcmask 130048   ;;  %vm677_vm1 = vcmask 7168  }
   0xc   : > { %p146_p3 = scmp.lt.s32.totalorder %s1349_s11, 63 }
   0xe   : > { %s3355_s11 = smov (!%p146_p3, %s1349_s11), 63 }
   0xf   : > { %s1357_s12 = smul.u32 56, %s3355_s11  ;;  %s1352_s16 = sshll.u32 %s3355_s11, 3 }
  0x10   : > { %s2764_s19 = scalar_lea.vmem %s2921_s1, %s1352_s16  ;;  %s2849_s22 = scalar_lea.vmem %s2922_s2, %s1352_s16 }
  0x11   : > { %s1403_s15 = scalar_lea.vmem %s2920_s0, %s1357_s12 }
  0x12   : > { %v178_v0 = vld [vmem:[%s1403_s15 + $0x70] sm:$0xff]  ;;  %v179_v1 = vld [vmem:[%s1403_s15 + $0x78] sm:$0xff]  ;;  %v180_v2 = vld [vmem:[%s1403_s15 + $0x80] sm:$0xff] }
  0x13   : > { %v181_v3 = vld [vmem:[%s1403_s15 + $0x88] sm:$0xff]  ;;  %v182_v4 = vld [vmem:[%s1403_s15 + $0x90] sm:$0xff]  ;;  %v407_v5 = vadd.f32 %v179_v1, %v178_v0  ;;  %v184_v6 = vld [vmem:[%s1403_s15 + $0xa0] sm:$0xff]  ;;  %v1411_v7 = vmul.f32 %v178_v0, %v178_v0  ;;  %v1413_v8 = vmul.f32 %v179_v1, %v179_v1  ;;  %v1415_v9 = vmul.f32 %v180_v2, %v180_v2 }
  0x14   : > { %v164_v10 = vld [vmem:[%s1403_s15] sm:$0xff]  ;;  %v165_v11 = vld [vmem:[%s1403_s15 + $0x8] sm:$0xff]  ;;  %v183_v12 = vld [vmem:[%s1403_s15 + $0x98] sm:$0xff]  ;;  %v1420_v14 = vmul.f32 %v181_v3, %v181_v3  ;;  %v1422_v15 = vmul.f32 %v182_v4, %v182_v4  ;;  %v412_v18 = vsel %vm393_vm0, %v184_v6, 0.0  ;;  %v1433_v26 = vmul.f32 %v184_v6, %v184_v6 }
  0x15   : > { %v408_v13 = vadd.f32 %v407_v5, %v180_v2  ;;  %v166_v16 = vld [vmem:[%s1403_s15 + $0x10] sm:$0xff]  ;;  %v388_v17 = vadd.f32 %v165_v11, %v164_v10  ;;  %v1426_v19 = vmul.f32 %v183_v12, %v183_v12  ;;  %v167_v20 = vld [vmem:[%s1403_s15 + $0x18] sm:$0xff]  ;;  %v710_v22 = vmul.f32 %v164_v10, %v164_v10  ;;  %v1431_v24 = vld [vmem:[%s1403_s15 + $0xa8] sm:$0xff] }
  0x16   : > { %v170_v21 = vld [vmem:[%s1403_s15 + $0x30] sm:$0xff]  ;;  %v711_v23 = vmul.f32 %v165_v11, %v165_v11  ;;  %v168_v27 = vld [vmem:[%s1403_s15 + $0x20] sm:$0xff]  ;;  %v1436_v29 = vmul.f32 %v166_v16, %v166_v16  ;;  %v1442_v31 = vld [vmem:[%s1403_s15 + $0xb8] sm:$0xff]  ;;  %v1446_v34 = vmul.f32 %v167_v20, %v167_v20 }
  0x17   : > { %v409_v25 = vadd.f32 %v408_v13, %v181_v3  ;;  %v389_v28 = vadd.f32 %v388_v17, %v166_v16  ;;  %v1439_v30 = vld [vmem:[%s1403_s15 + $0xb0] sm:$0xff]  ;;  %v169_v32 = vld [vmem:[%s1403_s15 + $0x28] sm:$0xff]  ;;  %v394_v33 = vsel %vm393_vm0, %v170_v21, 0.0  ;;  %v1449_v35 = vld [vmem:[%s1403_s15 + $0xc0] sm:$0xff]  ;;  %v1458_v41 = vmul.f32 %v168_v27, %v168_v27 }
  0x18   : > { %v1452_v36 = vld [vmem:[%s1403_s15 + $0xd8] sm:$0xff]  ;;  %v416_v37 = vadd.f32 %v1439_v30, %v1431_v24  ;;  %v1456_v38 = vadd.f32 %v711_v23, %v710_v22  ;;  %v1460_v42 = vmul.f32 %v169_v32, %v169_v32  ;;  %v172_v44 = vld [vmem:[%s1403_s15 + $0x40] sm:$0xff]  ;;  %v173_v45 = vld [vmem:[%s1403_s15 + $0x48] sm:$0xff]  ;;  %v1465_v46 = vmul.f32 %v170_v21, %v170_v21 }
  0x19   : > { %v410_v39 = vadd.f32 %v409_v25, %v182_v4  ;;  %v390_v40 = vadd.f32 %v389_v28, %v167_v20  ;;  %v171_v43 = vld [vmem:[%s1403_s15 + $0x38] sm:$0xff]  ;;  %v1468_v47 = vld [vmem:[%s1403_s15 + $0xc8] sm:$0xff]  ;;  %v421_v49 = vsel %vm393_vm0, %v1452_v36, 0.0  ;;  %v174_v50 = vld [vmem:[%s1403_s15 + $0x50] sm:$0xff]  ;;  %v718_v58 = vmul.f32 %v172_v44, %v172_v44 }
  0x1a   : > { %v417_v48 = vadd.f32 %v416_v37, %v1442_v31  ;;  %v398_v51 = vadd.f32 %v172_v44, %v171_v43  ;;  %v177_v54 = vld [vmem:[%s1403_s15 + $0x68] sm:$0xff]  ;;  %v1476_v55 = vld [vmem:[%s1403_s15 + $0x118] sm:$0xff]  ;;  %v1479_v56 = vld [vmem:[%s1403_s15 + $0x120] sm:$0xff]  ;;  %v717_v57 = vmul.f32 %v171_v43, %v171_v43  ;;  %v719_v1 = vmul.f32 %v173_v45, %v173_v45 }
  0x1b   : > { %v411_v52 = vadd.f32 %v410_v39, %v183_v12  ;;  %v391_v53 = vadd.f32 %v390_v40, %v168_v27  ;;  %v1482_v59 = vld [vmem:[%s1403_s15 + $0xd0] sm:$0xff]  ;;  %v175_v61 = vld [vmem:[%s1403_s15 + $0x58] sm:$0xff]  ;;  %v1487_v63 = vld [vmem:[%s1403_s15 + $0x128] sm:$0xff]  ;;  %v434_v0 = vadd.f32 %v1479_v56, %v1476_v55  ;;  %v403_v4 = vsel %vm393_vm0, %v177_v54, 0.0 }
  0x1c   : > { %v418_v60 = vadd.f32 %v417_v48, %v1449_v35  ;;  %v399_v62 = vadd.f32 %v398_v51, %v173_v45  ;;  %v1493_v5 = vld [vmem:[%s1403_s15 + $0x130] sm:$0xff]  ;;  %v1496_v6 = vld [vmem:[%s1403_s15 + $0x148] sm:$0xff]  ;;  %v1499_v10 = vld [vmem:[%s1403_s15 + $0xe0] sm:$0xff]  ;;  %v720_v11 = vmul.f32 %v174_v50, %v174_v50  ;;  %v721_v21 = vmul.f32 %v175_v61, %v175_v61 }
  0x1d   : > { %v413_v2 = vadd.f32 %v412_v18, %v411_v52  ;;  %v392_v3 = vadd.f32 %v391_v53, %v169_v32  ;;  %v176_v13 = vld [vmem:[%s1403_s15 + $0x60] sm:$0xff]  ;;  %v435_v17 = vadd.f32 %v434_v0, %v1487_v63  ;;  %v1505_v18 = vld [vmem:[%s1403_s15 + $0xe8] sm:$0xff]  ;;  %v1508_v20 = vld [vmem:[%s1403_s15 + $0xf0] sm:$0xff]  ;;  %v943_v37 = vadd.f32 %v718_v58, %v717_v57 }
  0x1e   : > { %v419_v12 = vadd.f32 %v418_v60, %v1468_v47  ;;  %v400_v16 = vadd.f32 %v399_v62, %v174_v50  ;;  %v1511_v23 = vld [vmem:[%s1403_s15 + $0x138] sm:$0xff]  ;;  %v1517_v27 = vld [vmem:[%s1403_s15 + $0x110] sm:$0xff]  ;;  %v425_v28 = vadd.f32 %v1505_v18, %v1499_v10  ;;  %v1521_v32 = vmul.f32 %v176_v13, %v176_v13  ;;  %v1528_v44 = vld [vmem:[%s1403_s15 + $0x188] sm:$0xff] }
  0x1f   : > { %414 = vadd.xlane.f32.xlu1 %v413_v2  ;;  %v395_v22 = vadd.f32 %v394_v33, %v392_v3  ;;  %v1514_v25 = vld [vmem:[%s1403_s15 + $0xf8] sm:$0xff]  ;;  %v436_v43 = vadd.f32 %v435_v17, %v1493_v5  ;;  %v439_v33 = vsel %vm393_vm0, %v1496_v6, 0.0  ;;  %v1531_v45 = vld [vmem:[%s1403_s15 + $0x190] sm:$0xff]  ;;  %v1537_v50 = vld [vmem:[%s1403_s15 + $0x140] sm:$0xff]  ;;  %v723_v57 = vmul.f32 %v177_v54, %v177_v54 }
  0x20   : > { %v420_v39 = vadd.f32 %v419_v12, %v1482_v59  ;;  %v401_v40 = vadd.f32 %v400_v16, %v175_v61  ;;  %v1534_v48 = vld [vmem:[%s1403_s15 + $0x198] sm:$0xff]  ;;  %v1540_v51 = vld [vmem:[%s1403_s15 + $0x100] sm:$0xff]  ;;  %v426_v52 = vadd.f32 %v425_v28, %v1508_v20  ;;  %v452_v53 = vadd.f32 %v1531_v45, %v1528_v44  ;;  %v1550_v2 = vld [vmem:[%s1403_s15 + $0x150] sm:$0xff] }
  0x21   : > { %396 = vadd.xlane.f32.xlu0 %v395_v22  ;;  %v944_v58 = vadd.f32 %v943_v37, %v719_v1  ;;  %v437_v62 = vadd.f32 %v436_v43, %v1511_v23  ;;  %v1547_v0 = vld [vmem:[%s1403_s15 + $0x1a0] sm:$0xff]  ;;  %3066 = vst [vmem:[#allocation2_spill] sm:$0xff] %v1550_v2  ;;  %v1553_v3 = vld [vmem:[%s1403_s15 + $0x158] sm:$0xff]  ;;  %v935_v12 = vadd.f32 %v1456_v38, %v1436_v29  ;;  %v1558_v16 = vld [vmem:[%s1403_s15 + $0x108] sm:$0xff]  ;;  %v430_v54 = vsel %vm393_vm0, %v1517_v27, 0.0 }
  0x22   : > { %v422_v60 = vadd.f32 %v421_v49, %v420_v39  ;;  %v402_v61 = vadd.f32 %v401_v40, %v176_v13  ;;  %3067 = vst [vmem:[#allocation3_spill] sm:$0xff] %v1553_v3  ;;  %v427_v49 = vadd.f32 %v426_v52, %v1514_v25  ;;  %v1564_v1 = vld [vmem:[%s1403_s15 + $0x1a8] sm:$0xff]  ;;  %v453_v13 = vadd.f32 %v452_v53, %v1534_v48  ;;  %v1568_v17 = vld [vmem:[%s1403_s15 + $0x160] sm:$0xff]  ;;  %v1574_v28 = vld [vmem:[%s1403_s15 + $0x1b8] sm:$0xff] }
  0x23   : > { %3068 = vst [vmem:[#allocation4_spill] sm:$0xff] %v1564_v1  ;;  %3069 = vst [vmem:[#allocation5_spill] sm:$0xff] %v1568_v17  ;;  %v443_v22 = vadd.f32 %v1553_v3, %v1550_v2  ;;  %v438_v38 = vadd.f32 %v437_v62, %v1537_v50  ;;  %v1577_v37 = vld [vmem:[%s1403_s15 + $0x168] sm:$0xff]  ;;  %v1580_v39 = vld [vmem:[%s1403_s15 + $0x1f8] sm:$0xff]  ;;  %v945_v40 = vadd.f32 %v944_v58, %v720_v11  ;;  %v948_v3 = vsel %vm393_vm0, %v723_v57, 0.0 }
  0x24   : > { %423 = vadd.xlane.f32.xlu1 %v422_v60  ;;  %v404_v29 = vadd.f32 %v403_v4, %v402_v61  ;;  %3070 = vst [vmem:[#allocation6_spill] sm:$0xff] %v1574_v28  ;;  %3071 = vst [vmem:[#allocation7_spill] sm:$0xff] %v1577_v37  ;;  %v936_v43 = vadd.f32 %v935_v12, %v1446_v34  ;;  %v428_v52 = vadd.f32 %v427_v49, %v1540_v51  ;;  %v1585_v53 = vld [vmem:[%s1403_s15 + $0x1b0] sm:$0xff]  ;;  %v1590_v61 = vld [vmem:[%s1403_s15 + $0x200] sm:$0xff] }
  0x25   : > { %3072 = vst [vmem:[#allocation8_spill] sm:$0xff] %v1580_v39  ;;  %v454_v4 = vadd.f32 %v453_v13, %v1547_v0  ;;  %v444_v60 = vadd.f32 %v443_v22, %v1568_v17  ;;  %3073 = vst [vmem:[#allocation9_spill] sm:$0xff] %v1590_v61  ;;  %v1593_v62 = vld [vmem:[%s1403_s15 + $0x208] sm:$0xff]  ;;  %v440_v34 = vadd.f32 %v439_v33, %v438_v38  ;;  %v1597_v11 = vld [vmem:[%s1403_s15 + $0x170] sm:$0xff]  ;;  %v457_v33 = vsel %vm393_vm0, %v1574_v28, 0.0 }
  0x26   : > { %3074 = vst [vmem:[#allocation10_spill] sm:$0xff] %v1593_v62  ;;  %405 = vadd.xlane.f32.xlu0 %v404_v29  ;;  %3075 = vst [vmem:[#allocation11_spill] sm:$0xff] %v1597_v11  ;;  %v1600_v58 = vld [vmem:[%s1403_s15 + $0x180] sm:$0xff]  ;;  %v1603_v12 = vld [vmem:[%s1403_s15 + $0x210] sm:$0xff]  ;;  %v470_v49 = vadd.f32 %v1590_v61, %v1580_v39  ;;  %v946_v13 = vadd.f32 %v945_v40, %v721_v21  ;;  %v937_v22 = vadd.f32 %v936_v43, %v1458_v41 }
  0x27   : > { %3076 = vst [vmem:[#allocation12_spill] sm:$0xff] %v1603_v12  ;;  %v429_v17 = vadd.f32 %v428_v52, %v1558_v16  ;;  %v455_v57 = vadd.f32 %v454_v4, %v1564_v1  ;;  %v445_v29 = vadd.f32 %v444_v60, %v1577_v37  ;;  %v1614_v38 = vld [vmem:[%s1403_s15 + $0x1c0] sm:$0xff]  ;;  %v1617_v2 = vld [vmem:[%s1403_s15 + $0x1c8] sm:$0xff]  ;;  %v1620_v21 = vld [vmem:[%s1403_s15 + $0x1d0] sm:$0xff] }
  0x28   : > { %3077 = vst [vmem:[#allocation13_spill] sm:$0xff] %v1614_v38  ;;  %3078 = vst [vmem:[#allocation14_spill] sm:$0xff] %v1617_v2  ;;  %441 = vadd.xlane.f32.xlu1 %v440_v34  ;;  %v1623_v41 = vld [vmem:[%s1403_s15 + $0x178] sm:$0xff]  ;;  %v1629_v43 = vld [vmem:[%s1403_s15 + $0x228] sm:$0xff]  ;;  %v471_v52 = vadd.f32 %v470_v49, %v1593_v62  ;;  %v461_v4 = vadd.f32 %v1617_v2, %v1614_v38  ;;  %v947_v60 = vadd.f32 %v946_v13, %v1521_v32 }
  0x29   : > { %3079 = vst [vmem:[#allocation15_spill] sm:$0xff] %v1620_v21  ;;  %v1626_v40 = vld [vmem:[%s1403_s15 + $0x218] sm:$0xff]  ;;  %v938_v61 = vadd.f32 %v937_v22, %v1460_v42  ;;  %v431_v39 = vadd.f32 %v430_v54, %v429_v17  ;;  %v456_v34 = vadd.f32 %v455_v57, %v1585_v53  ;;  %v446_v37 = vadd.f32 %v445_v29, %v1597_v11  ;;  %v1639_v1 = vld [vmem:[%s1403_s15 + $0x220] sm:$0xff]  ;;  %v1645_v49 = vld [vmem:[%s1403_s15 + $0x268] sm:$0xff] }
  0x2a   : > { %v1642_v28 = vld [vmem:[%s1403_s15 + $0x1d8] sm:$0xff]  ;;  %3081 = vst [vmem:[#allocation17_spill] sm:$0xff] %v1645_v49  ;;  %v1648_v2 = vld [vmem:[%s1403_s15 + $0x270] sm:$0xff]  ;;  %v939_v32 = vsel %vm393_vm0, %v1465_v46, 0.0  ;;  %v448_v42 = vsel %vm393_vm0, %v1600_v58, 0.0  ;;  %v472_v54 = vadd.f32 %v471_v52, %v1603_v12  ;;  %v1656_v17 = vld [vmem:[%s1403_s15 + $0x1e0] sm:$0xff]  ;;  %v462_v22 = vadd.f32 %v461_v4, %v1620_v21 }
  0x2b   : > { %3080 = vst [vmem:[#allocation16_spill] sm:$0xff] %v1642_v28  ;;  %3082 = vst [vmem:[#allocation18_spill] sm:$0xff] %v1648_v2  ;;  %v1659_v13 = vld [vmem:[%s1403_s15 + $0x1f0] sm:$0xff]  ;;  %v1663_v57 = vld [vmem:[%s1403_s15 + $0x278] sm:$0xff]  ;;  %v488_v29 = vadd.f32 %v1648_v2, %v1645_v49  ;;  %432 = vadd.xlane.f32.xlu0 %v431_v39  ;;  %v458_v46 = vadd.f32 %v457_v33, %v456_v34  ;;  %v447_v38 = vadd.f32 %v446_v37, %v1623_v41 }
  0x2c   : > { %3083 = vst [vmem:[#allocation19_spill] sm:$0xff] %v1656_v17  ;;  %3084 = vst [vmem:[#allocation20_spill] sm:$0xff] %v1659_v13  ;;  %v1669_v11 = vld [vmem:[%s1403_s15 + $0x1e8] sm:$0xff]  ;;  %v1672_v52 = vld [vmem:[%s1403_s15 + $0x280] sm:$0xff]  ;;  %v1677_v4 = vadd.f32 %v948_v3, %v947_v60  ;;  %v1679_v21 = vadd.f32 %v939_v32, %v938_v61  ;;  %v473_v62 = vadd.f32 %v472_v54, %v1626_v40  ;;  %v475_v60 = vsel %vm393_vm0, %v1629_v43, 0.0 }
  0x2d   : > { %3085 = vst [vmem:[#allocation21_spill] sm:$0xff] %v1663_v57  ;;  %3086 = vst [vmem:[#allocation22_spill] sm:$0xff] %v1672_v52  ;;  %v1675_v12 = vld [vmem:[%s1403_s15 + $0x230] sm:$0xff]  ;;  %v463_v39 = vadd.f32 %v462_v22, %v1642_v28  ;;  %v1684_v33 = vld [vmem:[%s1403_s15 + $0x298] sm:$0xff]  ;;  %v489_v37 = vadd.f32 %v488_v29, %v1663_v57  ;;  %v731_v3 = vmul.f32 %v1431_v24, %v1431_v24  ;;  %459 = vadd.xlane.f32.xlu1 %v458_v46 }
  0x2e   : > { %3087 = vst [vmem:[#allocation23_spill] sm:$0xff] %v1675_v12  ;;  %3088 = vst [vmem:[#allocation24_spill] sm:$0xff] %v1679_v21  ;;  %v1688_v34 = vld [vmem:[%s1403_s15 + $0x238] sm:$0xff]  ;;  %v1691_v2 = vld [vmem:[%s1403_s15 + $0x240] sm:$0xff]  ;;  %v449_v61 = vadd.f32 %v448_v42, %v447_v38  ;;  %v466_v32 = vsel %vm393_vm0, %v1659_v13, 0.0  ;;  %v474_v24 = vadd.f32 %v473_v62, %v1639_v1  ;;  %v732_v13 = vmul.f32 %v1439_v30, %v1439_v30 }
  0x2f   : > { %3089 = vst [vmem:[#allocation25_spill] sm:$0xff] %v1684_v33  ;;  %3090 = vst [vmem:[#allocation26_spill] sm:$0xff] %v1688_v34  ;;  %v1700_v54 = vld [vmem:[%s1403_s15 + $0x288] sm:$0xff]  ;;  %v1706_v29 = vld [vmem:[%s1403_s15 + $0x260] sm:$0xff]  ;;  %v479_v57 = vadd.f32 %v1688_v34, %v1675_v12  ;;  %v464_v38 = vadd.f32 %v463_v39, %v1656_v17  ;;  %v490_v42 = vadd.f32 %v489_v37, %v1672_v52  ;;  %v493_v39 = vsel %vm393_vm0, %v1684_v33, 0.0 }
  0x30   : > { %3091 = vst [vmem:[#allocation27_spill] sm:$0xff] %v1691_v2  ;;  %3092 = vst [vmem:[#allocation28_spill] sm:$0xff] %v1700_v54  ;;  %v1703_v22 = vld [vmem:[%s1403_s15 + $0x248] sm:$0xff]  ;;  %v1714_v46 = vld [vmem:[%s1403_s15 + $0x2d8] sm:$0xff]  ;;  %450 = vadd.xlane.f32.xlu0 %v449_v61  ;;  %v733_v52 = vmul.f32 %v1442_v31, %v1442_v31  ;;  %v476_v17 = vadd.f32 %v475_v60, %v474_v24  ;;  %v484_v33 = vsel %vm393_vm0, %v1706_v29, 0.0 }
  0x31   : > { %3093 = vst [vmem:[#allocation29_spill] sm:$0xff] %v1703_v22  ;;  %3094 = vst [vmem:[#allocation30_spill] sm:$0xff] %v1706_v29  ;;  %v1717_v49 = vld [vmem:[%s1403_s15 + $0x2e0] sm:$0xff]  ;;  %v1720_v21 = vld [vmem:[%s1403_s15 + $0x2e8] sm:$0xff]  ;;  %v480_v34 = vadd.f32 %v479_v57, %v1691_v2  ;;  %v465_v30 = vadd.f32 %v464_v38, %v1669_v11  ;;  %v491_v61 = vadd.f32 %v490_v42, %v1700_v54 }
  0x32   : > { %3095 = vst [vmem:[#allocation31_spill] sm:$0xff] %v1714_v46  ;;  %3096 = vst [vmem:[#allocation32_spill] sm:$0xff] %v1717_v49  ;;  %v1725_v62 = vld [vmem:[%s1403_s15 + $0x290] sm:$0xff]  ;;  %v506_v12 = vadd.f32 %v1717_v49, %v1714_v46  ;;  %v1745_v57 = vld [vmem:[%s1403_s15 + $0x2a0] sm:$0xff]  ;;  %v734_v46 = vmul.f32 %v1449_v35, %v1449_v35  ;;  %477 = vadd.xlane.f32.xlu1 %v476_v17 }
  0x33   : > { %3097 = vst [vmem:[#allocation33_spill] sm:$0xff] %v1720_v21  ;;  %3098 = vst [vmem:[#allocation34_spill] sm:$0xff] %v1725_v62  ;;  %v1730_v37 = vld [vmem:[%s1403_s15 + $0x250] sm:$0xff]  ;;  %v1748_v2 = vld [vmem:[%s1403_s15 + $0x2a8] sm:$0xff]  ;;  %v481_v31 = vadd.f32 %v480_v34, %v1703_v22  ;;  %v467_v29 = vadd.f32 %v466_v32, %v465_v30  ;;  %v492_v54 = vadd.f32 %v491_v61, %v1725_v62 }
  0x34   : > { %3099 = vst [vmem:[#allocation35_spill] sm:$0xff] %v1730_v37  ;;  %v1742_v28 = vld [vmem:[%s1403_s15 + $0x2f0] sm:$0xff]  ;;  %3101 = vst [vmem:[#allocation37_spill] sm:$0xff] %v1745_v57  ;;  %v1751_v49 = vld [vmem:[%s1403_s15 + $0x258] sm:$0xff]  ;;  %v507_v24 = vadd.f32 %v506_v12, %v1720_v21  ;;  %v497_v42 = vadd.f32 %v1748_v2, %v1745_v57  ;;  %v735_v22 = vmul.f32 %v1468_v47, %v1468_v47 }
  0x35   : > { %3100 = vst [vmem:[#allocation36_spill] sm:$0xff] %v1742_v28  ;;  %3102 = vst [vmem:[#allocation38_spill] sm:$0xff] %v1748_v2  ;;  %v1755_v60 = vld [vmem:[%s1403_s15 + $0x2f8] sm:$0xff]  ;;  %v1759_v38 = vld [vmem:[%s1403_s15 + $0x2b0] sm:$0xff]  ;;  %v961_v2 = vadd.f32 %v732_v13, %v731_v3  ;;  %v482_v57 = vadd.f32 %v481_v31, %v1730_v37  ;;  %v736_v62 = vmul.f32 %v1482_v59, %v1482_v59  ;;  %468 = vadd.xlane.f32.xlu0 %v467_v29 }
  0x36   : > { %3103 = vst [vmem:[#allocation39_spill] sm:$0xff] %v1751_v49  ;;  %3104 = vst [vmem:[#allocation40_spill] sm:$0xff] %v1755_v60  ;;  %v1767_v34 = vld [vmem:[%s1403_s15 + $0x308] sm:$0xff]  ;;  %v1770_v12 = vld [vmem:[%s1403_s15 + $0x2b8] sm:$0xff]  ;;  %v508_v17 = vadd.f32 %v507_v24, %v1742_v28  ;;  %v498_v32 = vadd.f32 %v497_v42, %v1759_v38  ;;  %v494_v47 = vadd.f32 %v493_v39, %v492_v54 }
  0x37   : > { %3105 = vst [vmem:[#allocation41_spill] sm:$0xff] %v1759_v38  ;;  %3106 = vst [vmem:[#allocation42_spill] sm:$0xff] %v1767_v34  ;;  %v1773_v21 = vld [vmem:[%s1403_s15 + $0x348] sm:$0xff]  ;;  %v1779_v35 = vld [vmem:[%s1403_s15 + $0x300] sm:$0xff]  ;;  %v737_v42 = vmul.f32 %v1452_v36, %v1452_v36  ;;  %v962_v38 = vadd.f32 %v961_v2, %v733_v52  ;;  %v483_v59 = vadd.f32 %v482_v57, %v1751_v49  ;;  %v511_v54 = vsel %vm393_vm0, %v1767_v34, 0.0 }
  0x38   : > { %3107 = vst [vmem:[#allocation43_spill] sm:$0xff] %v1770_v12  ;;  %3108 = vst [vmem:[#allocation44_spill] sm:$0xff] %v1773_v21  ;;  %v1784_v30 = vld [vmem:[%s1403_s15 + $0x350] sm:$0xff]  ;;  %v1787_v61 = vld [vmem:[%s1403_s15 + $0x358] sm:$0xff]  ;;  %v509_v29 = vadd.f32 %v508_v17, %v1755_v60  ;;  %v499_v39 = vadd.f32 %v498_v32, %v1770_v12  ;;  %495 = vadd.xlane.f32.xlu1 %v494_v47 }
  0x39   : > { %3109 = vst [vmem:[#allocation45_spill] sm:$0xff] %v1784_v30  ;;  %3110 = vst [vmem:[#allocation46_spill] sm:$0xff] %v1787_v61  ;;  %v1792_v13 = vld [vmem:[%s1403_s15 + $0x2c0] sm:$0xff]  ;;  %v1795_v3 = vld [vmem:[%s1403_s15 + $0x2d0] sm:$0xff]  ;;  %v524_v24 = vadd.f32 %v1784_v30, %v1773_v21  ;;  %v963_v32 = vadd.f32 %v962_v38, %v734_v46  ;;  %v952_v21 = vadd.f32 %v1413_v8, %v1411_v7 }
  0x3a   : > { %v1798_v31 = vld [vmem:[%s1403_s15 + $0x360] sm:$0xff]  ;;  %v1810_v28 = vld [vmem:[%s1403_s15 + $0x310] sm:$0xff]  ;;  %v1813_v37 = vld [vmem:[%s1403_s15 + $0x318] sm:$0xff]  ;;  %v485_v12 = vadd.f32 %v484_v33, %v483_v59  ;;  %v510_v47 = vadd.f32 %v509_v29, %v1779_v35  ;;  %v500_v60 = vadd.f32 %v499_v39, %v1792_v13  ;;  %v502_v34 = vsel %vm393_vm0, %v1795_v3, 0.0 }
  0x3b   : > { %3111 = vst [vmem:[#allocation47_spill] sm:$0xff] %v1798_v31  ;;  %3112 = vst [vmem:[#allocation48_spill] sm:$0xff] %v1810_v28  ;;  %v1816_v30 = vld [vmem:[%s1403_s15 + $0x320] sm:$0xff]  ;;  %v1819_v36 = vld [vmem:[%s1403_s15 + $0x2c8] sm:$0xff]  ;;  %v525_v57 = vadd.f32 %v524_v24, %v1787_v61  ;;  %v515_v17 = vadd.f32 %v1813_v37, %v1810_v28  ;;  %v966_v29 = vsel %vm393_vm0, %v737_v42, 0.0  ;;  %v953_v61 = vadd.f32 %v952_v21, %v1415_v9 }
  0x3c   : > { %3113 = vst [vmem:[#allocation49_spill] sm:$0xff] %v1813_v37  ;;  %3114 = vst [vmem:[#allocation50_spill] sm:$0xff] %v1816_v30  ;;  %v1822_v2 = vld [vmem:[%s1403_s15 + $0x368] sm:$0xff]  ;;  %v1825_v52 = vld [vmem:[%s1403_s15 + $0x378] sm:$0xff]  ;;  %486 = vadd.xlane.f32.xlu0 %v485_v12  ;;  %v512_v39 = vadd.f32 %v511_v54, %v510_v47  ;;  %v501_v28 = vadd.f32 %v500_v60, %v1819_v36 }
  0x3d   : > { %3115 = vst [vmem:[#allocation51_spill] sm:$0xff] %v1822_v2  ;;  %v1837_v49 = vld [vmem:[%s1403_s15 + $0x328] sm:$0xff]  ;;  %v1840_v24 = vld [vmem:[%s1403_s15 + $0x3b8] sm:$0xff]  ;;  %v1843_v37 = vld [vmem:[%s1403_s15 + $0x3c0] sm:$0xff]  ;;  %v526_v7 = vadd.f32 %v525_v57, %v1798_v31  ;;  %v516_v33 = vadd.f32 %v515_v17, %v1816_v30  ;;  %v964_v30 = vadd.f32 %v963_v32, %v735_v22  ;;  %v529_v12 = vsel %vm393_vm0, %v1825_v52, 0.0 }
  0x3e   : > { %3116 = vst [vmem:[#allocation52_spill] sm:$0xff] %v1837_v49  ;;  %3117 = vst [vmem:[#allocation53_spill] sm:$0xff] %v1840_v24  ;;  %v1846_v46 = vld [vmem:[%s1403_s15 + $0x370] sm:$0xff]  ;;  %v1854_v38 = vld [vmem:[%s1403_s15 + $0x3c8] sm:$0xff]  ;;  %v542_v59 = vadd.f32 %v1843_v37, %v1840_v24  ;;  %513 = vadd.xlane.f32.xlu1 %v512_v39  ;;  %v503_v9 = vadd.f32 %v502_v34, %v501_v28 }
  0x3f   : > { %3118 = vst [vmem:[#allocation54_spill] sm:$0xff] %v1843_v37  ;;  %v1850_v8 = vld [vmem:[%s1403_s15 + $0x330] sm:$0xff]  ;;  %3120 = vst [vmem:[#allocation56_spill] sm:$0xff] %v1854_v38  ;;  %v1861_v57 = vld [vmem:[%s1403_s15 + $0x340] sm:$0xff]  ;;  %v527_v37 = vadd.f32 %v526_v7, %v1822_v2  ;;  %v517_v60 = vadd.f32 %v516_v33, %v1837_v49  ;;  %v965_v33 = vadd.f32 %v964_v30, %v736_v62 }
  0x40   : > { %3119 = vst [vmem:[#allocation55_spill] sm:$0xff] %v1850_v8  ;;  %3121 = vst [vmem:[#allocation57_spill] sm:$0xff] %v1861_v57  ;;  %v1864_v31 = vld [vmem:[%s1403_s15 + $0x3d0] sm:$0xff]  ;;  %v1867_v17 = vld [vmem:[%s1403_s15 + $0x380] sm:$0xff]  ;;  %v543_v54 = vadd.f32 %v542_v59, %v1854_v38  ;;  %v954_v59 = vadd.f32 %v953_v61, %v1420_v14  ;;  %v520_v28 = vsel %vm393_vm0, %v1861_v57, 0.0  ;;  %504 = vadd.xlane.f32.xlu0 %v503_v9 }
  0x41   : > { %3122 = vst [vmem:[#allocation58_spill] sm:$0xff] %v1864_v31  ;;  %3123 = vst [vmem:[#allocation59_spill] sm:$0xff] %v1867_v17  ;;  %v1874_v42 = vld [vmem:[%s1403_s15 + $0x338] sm:$0xff]  ;;  %v1879_v47 = vld [vmem:[%s1403_s15 + $0x388] sm:$0xff]  ;;  %v528_v38 = vadd.f32 %v527_v37, %v1846_v46  ;;  %v518_v39 = vadd.f32 %v517_v60, %v1850_v8 }
  0x42   : > { %3124 = vst [vmem:[#allocation60_spill] sm:$0xff] %v1879_v47  ;;  %v1882_v24 = vld [vmem:[%s1403_s15 + $0x390] sm:$0xff]  ;;  %v1885_v21 = vld [vmem:[%s1403_s15 + $0x3d8] sm:$0xff]  ;;  %v1888_v22 = vld [vmem:[%s1403_s15 + $0x3e8] sm:$0xff]  ;;  %v533_v7 = vadd.f32 %v1879_v47, %v1867_v17  ;;  %v544_v34 = vadd.f32 %v543_v54, %v1864_v31  ;;  %v1922_v54 = vadd.f32 %v966_v29, %v965_v33  ;;  %v955_v47 = vadd.f32 %v954_v59, %v1422_v15 }
  0x43   : > { %3125 = vst [vmem:[#allocation61_spill] sm:$0xff] %v1882_v24  ;;  %v1891_v32 = vld [vmem:[%s1403_s15 + $0x398] sm:$0xff]  ;;  %v1902_v49 = vld [vmem:[%s1403_s15 + $0x428] sm:$0xff]  ;;  %v1905_v2 = vld [vmem:[%s1403_s15 + $0x430] sm:$0xff]  ;;  %v530_v17 = vadd.f32 %v529_v12, %v528_v38  ;;  %v519_v9 = vadd.f32 %v518_v39, %v1874_v42  ;;  %v957_v29 = vsel %vm393_vm0, %v1433_v26, 0.0  ;;  %v547_v15 = vsel %vm393_vm0, %v1888_v22, 0.0 }
  0x44   : > { %3126 = vst [vmem:[#allocation62_spill] sm:$0xff] %v1891_v32  ;;  %3127 = vst [vmem:[#allocation63_spill] sm:$0xff] %v1902_v49  ;;  %v1908_v62 = vld [vmem:[%s1403_s15 + $0x438] sm:$0xff]  ;;  %v1911_v14 = vld [vmem:[%s1403_s15 + $0x3e0] sm:$0xff]  ;;  %v534_v61 = vadd.f32 %v533_v7, %v1882_v24  ;;  %v560_v60 = vadd.f32 %v1905_v2, %v1902_v49  ;;  %v545_v31 = vadd.f32 %v544_v34, %v1885_v21 }
  0x45   : > { %3128 = vst [vmem:[#allocation64_spill] sm:$0xff] %v1905_v2  ;;  %3129 = vst [vmem:[#allocation65_spill] sm:$0xff] %v1908_v62  ;;  %v1914_v37 = vld [vmem:[%s1403_s15 + $0x3a0] sm:$0xff]  ;;  %v1917_v30 = vld [vmem:[%s1403_s15 + $0x3b0] sm:$0xff]  ;;  %531 = vadd.xlane.f32.xlu1 %v530_v17  ;;  %v521_v26 = vadd.f32 %v520_v28, %v519_v9 }
  0x46   : > { %3130 = vst [vmem:[#allocation66_spill] sm:$0xff] %v1914_v37  ;;  %3131 = vst [vmem:[#allocation67_spill] sm:$0xff] %v1917_v30  ;;  %v1928_v8 = vld [vmem:[%s1403_s15 + $0x3a8] sm:$0xff]  ;;  %v1931_v57 = vld [vmem:[%s1403_s15 + $0x440] sm:$0xff]  ;;  %v535_v38 = vadd.f32 %v534_v61, %v1891_v32  ;;  %v561_v59 = vadd.f32 %v560_v60, %v1908_v62  ;;  %v546_v49 = vadd.f32 %v545_v31, %v1911_v14  ;;  %v538_v61 = vsel %vm393_vm0, %v1917_v30, 0.0 }
  0x47   : > { %3132 = vst [vmem:[#allocation68_spill] sm:$0xff] %v1931_v57  ;;  %v1934_v7 = vld [vmem:[%s1403_s15 + $0x3f0] sm:$0xff]  ;;  %v1937_v2 = vld [vmem:[%s1403_s15 + $0x3f8] sm:$0xff]  ;;  %v1945_v12 = vld [vmem:[%s1403_s15 + $0x448] sm:$0xff]  ;;  %v956_v62 = vadd.f32 %v955_v47, %v1426_v19  ;;  %v745_v30 = vmul.f32 %v1476_v55, %v1476_v55  ;;  %522 = vadd.xlane.f32.xlu0 %v521_v26 }
  0x48   : > { %3133 = vst [vmem:[#allocation69_spill] sm:$0xff] %v1934_v7  ;;  %3134 = vst [vmem:[#allocation70_spill] sm:$0xff] %v1937_v2  ;;  %v1948_v33 = vld [vmem:[%s1403_s15 + $0x458] sm:$0xff]  ;;  %v1952_v39 = vld [vmem:[%s1403_s15 + $0x400] sm:$0xff]  ;;  %v551_v34 = vadd.f32 %v1937_v2, %v1934_v7  ;;  %v536_v2 = vadd.f32 %v535_v38, %v1914_v37  ;;  %v562_v17 = vadd.f32 %v561_v59, %v1931_v57 }
  0x49   : > { %3135 = vst [vmem:[#allocation71_spill] sm:$0xff] %v1945_v12  ;;  %3136 = vst [vmem:[#allocation72_spill] sm:$0xff] %v1948_v33  ;;  %v1960_v32 = vld [vmem:[%s1403_s15 + $0x450] sm:$0xff]  ;;  %v1963_v24 = vld [vmem:[%s1403_s15 + $0x408] sm:$0xff]  ;;  %v548_v19 = vadd.f32 %v547_v15, %v546_v49  ;;  %v565_v47 = vsel %vm393_vm0, %v1948_v33, 0.0  ;;  %v1996_v57 = vadd.f32 %v957_v29, %v956_v62  ;;  %v746_v62 = vmul.f32 %v1479_v56, %v1479_v56 }
  0x4a   : > { %3137 = vst [vmem:[#allocation73_spill] sm:$0xff] %v1952_v39  ;;  %3138 = vst [vmem:[#allocation74_spill] sm:$0xff] %v1960_v32  ;;  %v1966_v60 = vld [vmem:[%s1403_s15 + $0x498] sm:$0xff]  ;;  %v1972_v28 = vld [vmem:[%s1403_s15 + $0x420] sm:$0xff]  ;;  %v552_v31 = vadd.f32 %v551_v34, %v1952_v39  ;;  %v537_v55 = vadd.f32 %v536_v2, %v1928_v8  ;;  %v563_v26 = vadd.f32 %v562_v17, %v1945_v12 }
  0x4b   : > { %3139 = vst [vmem:[#allocation75_spill] sm:$0xff] %v1963_v24  ;;  %3140 = vst [vmem:[#allocation76_spill] sm:$0xff] %v1966_v60  ;;  %v1976_v9 = vld [vmem:[%s1403_s15 + $0x4a0] sm:$0xff]  ;;  %v1979_v7 = vld [vmem:[%s1403_s15 + $0x4a8] sm:$0xff]  ;;  %549 = vadd.xlane.f32.xlu1 %v548_v19  ;;  %v556_v29 = vsel %vm393_vm0, %v1972_v28, 0.0 }
  0x4c   : > { %3141 = vst [vmem:[#allocation77_spill] sm:$0xff] %v1972_v28  ;;  %3142 = vst [vmem:[#allocation78_spill] sm:$0xff] %v1976_v9  ;;  %v1986_v38 = vld [vmem:[%s1403_s15 + $0x410] sm:$0xff]  ;;  %v1992_v34 = vld [vmem:[%s1403_s15 + $0x4c8] sm:$0xff]  ;;  %v578_v39 = vadd.f32 %v1976_v9, %v1966_v60  ;;  %v553_v49 = vadd.f32 %v552_v31, %v1963_v24  ;;  %v747_v60 = vmul.f32 %v1487_v63, %v1487_v63 }
  0x4d   : > { %3143 = vst [vmem:[#allocation79_spill] sm:$0xff] %v1979_v7  ;;  %3144 = vst [vmem:[#allocation80_spill] sm:$0xff] %v1986_v38  ;;  %v1989_v59 = vld [vmem:[%s1403_s15 + $0x4b0] sm:$0xff]  ;;  %v2002_v15 = vld [vmem:[%s1403_s15 + $0x460] sm:$0xff]  ;;  %v539_v24 = vadd.f32 %v538_v61, %v537_v55  ;;  %v564_v56 = vadd.f32 %v563_v26, %v1960_v32  ;;  %v583_v28 = vsel %vm393_vm0, %v1992_v34, 0.0  ;;  %v751_v32 = vmul.f32 %v1496_v6, %v1496_v6 }
  0x4e   : > { %3145 = vst [vmem:[#allocation81_spill] sm:$0xff] %v1989_v59  ;;  %3146 = vst [vmem:[#allocation82_spill] sm:$0xff] %v1992_v34  ;;  %v2005_v33 = vld [vmem:[%s1403_s15 + $0x468] sm:$0xff]  ;;  %v2008_v37 = vld [vmem:[%s1403_s15 + $0x470] sm:$0xff]  ;;  %v579_v31 = vadd.f32 %v578_v39, %v1979_v7  ;;  %v554_v19 = vadd.f32 %v553_v49, %v1986_v38  ;;  %v748_v34 = vmul.f32 %v1493_v5, %v1493_v5 }
  0x4f   : > { %3147 = vst [vmem:[#allocation83_spill] sm:$0xff] %v2002_v15  ;;  %3148 = vst [vmem:[#allocation84_spill] sm:$0xff] %v2005_v33  ;;  %v2013_v2 = vld [vmem:[%s1403_s15 + $0x418] sm:$0xff]  ;;  %v569_v9 = vadd.f32 %v2005_v33, %v2002_v15  ;;  %v2033_v39 = vld [vmem:[%s1403_s15 + $0x508] sm:$0xff]  ;;  %540 = vadd.xlane.f32.xlu0 %v539_v24  ;;  %v566_v7 = vadd.f32 %v565_v47, %v564_v56 }
  0x50   : > { %3149 = vst [vmem:[#allocation85_spill] sm:$0xff] %v2008_v37  ;;  %3150 = vst [vmem:[#allocation86_spill] sm:$0xff] %v2013_v2  ;;  %v2018_v17 = vld [vmem:[%s1403_s15 + $0x4b8] sm:$0xff]  ;;  %v2036_v33 = vld [vmem:[%s1403_s15 + $0x510] sm:$0xff]  ;;  %v580_v63 = vadd.f32 %v579_v31, %v1989_v59  ;;  %v555_v38 = vadd.f32 %v554_v19, %v2013_v2 }
  0x51   : > { %v2030_v12 = vld [vmem:[%s1403_s15 + $0x478] sm:$0xff]  ;;  %3152 = vst [vmem:[#allocation88_spill] sm:$0xff] %v2033_v39  ;;  %3153 = vst [vmem:[#allocation89_spill] sm:$0xff] %v2036_v33  ;;  %v2039_v15 = vld [vmem:[%s1403_s15 + $0x4c0] sm:$0xff]  ;;  %v570_v55 = vadd.f32 %v569_v9, %v2008_v37  ;;  %v596_v49 = vadd.f32 %v2036_v33, %v2033_v39  ;;  %v749_v33 = vmul.f32 %v1511_v23, %v1511_v23  ;;  %567 = vadd.xlane.f32.xlu1 %v566_v7 }
  0x52   : > { %3151 = vst [vmem:[#allocation87_spill] sm:$0xff] %v2030_v12  ;;  %3154 = vst [vmem:[#allocation90_spill] sm:$0xff] %v2039_v15  ;;  %v2043_v61 = vld [vmem:[%s1403_s15 + $0x480] sm:$0xff]  ;;  %v2047_v26 = vld [vmem:[%s1403_s15 + $0x518] sm:$0xff]  ;;  %v979_v39 = vadd.f32 %v746_v62, %v745_v30  ;;  %v581_v5 = vadd.f32 %v580_v63, %v2018_v17  ;;  %v557_v23 = vadd.f32 %v556_v29, %v555_v38 }
  0x53   : > { %3155 = vst [vmem:[#allocation91_spill] sm:$0xff] %v2043_v61  ;;  %3156 = vst [vmem:[#allocation92_spill] sm:$0xff] %v2047_v26  ;;  %v2055_v31 = vld [vmem:[%s1403_s15 + $0x488] sm:$0xff]  ;;  %v2058_v59 = vld [vmem:[%s1403_s15 + $0x490] sm:$0xff]  ;;  %v571_v24 = vadd.f32 %v570_v55, %v2030_v12  ;;  %v597_v56 = vadd.f32 %v596_v49, %v2047_v26  ;;  %v750_v49 = vmul.f32 %v1537_v50, %v1537_v50 }
  0x54   : > { %3157 = vst [vmem:[#allocation93_spill] sm:$0xff] %v2058_v59  ;;  %v2061_v9 = vld [vmem:[%s1403_s15 + $0x520] sm:$0xff]  ;;  %v2064_v37 = vld [vmem:[%s1403_s15 + $0x4d0] sm:$0xff]  ;;  %v2071_v47 = vld [vmem:[%s1403_s15 + $0x538] sm:$0xff]  ;;  %v980_v26 = vadd.f32 %v979_v39, %v747_v60  ;;  %v582_v12 = vadd.f32 %v581_v5, %v2039_v15  ;;  %v574_v7 = vsel %vm393_vm0, %v2058_v59, 0.0  ;;  %558 = vadd.xlane.f32.xlu0 %v557_v23 }
  0x55   : > { %3158 = vst [vmem:[#allocation94_spill] sm:$0xff] %v2061_v9  ;;  %3159 = vst [vmem:[#allocation95_spill] sm:$0xff] %v2064_v37  ;;  %v2075_v19 = vld [vmem:[%s1403_s15 + $0x4d8] sm:$0xff]  ;;  %v2078_v2 = vld [vmem:[%s1403_s15 + $0x4e0] sm:$0xff]  ;;  %v572_v6 = vadd.f32 %v571_v24, %v2043_v61  ;;  %v598_v38 = vadd.f32 %v597_v56, %v2061_v9  ;;  %v601_v60 = vsel %vm393_vm0, %v2071_v47, 0.0 }
  0x56   : > { %3160 = vst [vmem:[#allocation96_spill] sm:$0xff] %v2071_v47  ;;  %3161 = vst [vmem:[#allocation97_spill] sm:$0xff] %v2075_v19  ;;  %v2083_v30 = vld [vmem:[%s1403_s15 + $0x528] sm:$0xff]  ;;  %v2089_v63 = vld [vmem:[%s1403_s15 + $0x500] sm:$0xff]  ;;  %v587_v55 = vadd.f32 %v2075_v19, %v2064_v37  ;;  %v981_v56 = vadd.f32 %v980_v26, %v748_v34  ;;  %v584_v9 = vadd.f32 %v583_v28, %v582_v12 }
  0x57   : > { %3162 = vst [vmem:[#allocation98_spill] sm:$0xff] %v2078_v2  ;;  %3163 = vst [vmem:[#allocation99_spill] sm:$0xff] %v2083_v30  ;;  %v2086_v62 = vld [vmem:[%s1403_s15 + $0x4e8] sm:$0xff]  ;;  %v2101_v29 = vld [vmem:[%s1403_s15 + $0x578] sm:$0xff]  ;;  %v573_v61 = vadd.f32 %v572_v6, %v2055_v31  ;;  %v599_v23 = vadd.f32 %v598_v38, %v2083_v30  ;;  %v592_v12 = vsel %vm393_vm0, %v2089_v63, 0.0 }
  0x58   : > { %3164 = vst [vmem:[#allocation100_spill] sm:$0xff] %v2086_v62  ;;  %3165 = vst [vmem:[#allocation101_spill] sm:$0xff] %v2089_v63  ;;  %v2104_v19 = vld [vmem:[%s1403_s15 + $0x580] sm:$0xff]  ;;  %v2107_v37 = vld [vmem:[%s1403_s15 + $0x588] sm:$0xff]  ;;  %v588_v5 = vadd.f32 %v587_v55, %v2078_v2  ;;  %v984_v2 = vsel %vm393_vm0, %v751_v32, 0.0  ;;  %585 = vadd.xlane.f32.xlu1 %v584_v9 }
  0x59   : > { %3166 = vst [vmem:[#allocation102_spill] sm:$0xff] %v2101_v29  ;;  %3167 = vst [vmem:[#allocation103_spill] sm:$0xff] %v2104_v19  ;;  %v2110_v50 = vld [vmem:[%s1403_s15 + $0x530] sm:$0xff]  ;;  %v614_v24 = vadd.f32 %v2104_v19, %v2101_v29  ;;  %v2123_v59 = vld [vmem:[%s1403_s15 + $0x4f8] sm:$0xff]  ;;  %v575_v32 = vadd.f32 %v574_v7, %v573_v61 }
  0x5a   : > { %3168 = vst [vmem:[#allocation104_spill] sm:$0xff] %v2107_v37  ;;  %v2115_v39 = vld [vmem:[%s1403_s15 + $0x4f0] sm:$0xff]  ;;  %3169 = vst [vmem:[#allocation105_spill] sm:$0xff] %v2123_v59  ;;  %v2129_v15 = vld [vmem:[%s1403_s15 + $0x540] sm:$0xff]  ;;  %v589_v34 = vadd.f32 %v588_v5, %v2086_v62  ;;  %v600_v5 = vadd.f32 %v599_v23, %v2110_v50 }
  0x5b   : > { %v2126_v47 = vld [vmem:[%s1403_s15 + $0x590] sm:$0xff]  ;;  %3171 = vst [vmem:[#allocation107_spill] sm:$0xff] %v2129_v15  ;;  %v2132_v55 = vld [vmem:[%s1403_s15 + $0x548] sm:$0xff]  ;;  %v2139_v28 = vld [vmem:[%s1403_s15 + $0x598] sm:$0xff]  ;;  %v615_v6 = vadd.f32 %v614_v24, %v2107_v37  ;;  %v982_v24 = vadd.f32 %v981_v56, %v749_v33  ;;  %v738_v37 = vmul.f32 %v1499_v10, %v1499_v10  ;;  %v739_v33 = vmul.f32 %v1505_v18, %v1505_v18 }
  0x5c   : > { %3170 = vst [vmem:[#allocation106_spill] sm:$0xff] %v2126_v47  ;;  %3172 = vst [vmem:[#allocation108_spill] sm:$0xff] %v2132_v55  ;;  %v2142_v26 = vld [vmem:[%s1403_s15 + $0x5a8] sm:$0xff]  ;;  %v2146_v38 = vld [vmem:[%s1403_s15 + $0x550] sm:$0xff]  ;;  %v605_v19 = vadd.f32 %v2132_v55, %v2129_v15  ;;  %v590_v30 = vadd.f32 %v589_v34, %v2115_v39  ;;  %576 = vadd.xlane.f32.xlu0 %v575_v32  ;;  %v602_v10 = vadd.f32 %v601_v60, %v600_v5 }
  0x5d   : > { %3173 = vst [vmem:[#allocation109_spill] sm:$0xff] %v2139_v28  ;;  %3174 = vst [vmem:[#allocation110_spill] sm:$0xff] %v2142_v26  ;;  %v2152_v29 = vld [vmem:[%s1403_s15 + $0x5a0] sm:$0xff]  ;;  %v2155_v63 = vld [vmem:[%s1403_s15 + $0x558] sm:$0xff]  ;;  %v616_v9 = vadd.f32 %v615_v6, %v2126_v47  ;;  %v619_v56 = vsel %vm393_vm0, %v2142_v26, 0.0  ;;  %v983_v15 = vadd.f32 %v982_v24, %v750_v49 }
  0x5e   : > { %3175 = vst [vmem:[#allocation111_spill] sm:$0xff] %v2146_v38  ;;  %3176 = vst [vmem:[#allocation112_spill] sm:$0xff] %v2155_v63  ;;  %v2158_v62 = vld [vmem:[%s1403_s15 + $0x5e8] sm:$0xff]  ;;  %v2165_v61 = vld [vmem:[%s1403_s15 + $0x570] sm:$0xff]  ;;  %v606_v7 = vadd.f32 %v605_v19, %v2146_v38  ;;  %v591_v47 = vadd.f32 %v590_v30, %v2123_v59  ;;  %603 = vadd.xlane.f32.xlu1 %v602_v10 }
  0x5f   : > { %3177 = vst [vmem:[#allocation113_spill] sm:$0xff] %v2158_v62  ;;  %3178 = vst [vmem:[#allocation114_spill] sm:$0xff] %v2165_v61  ;;  %v2169_v23 = vld [vmem:[%s1403_s15 + $0x5f0] sm:$0xff]  ;;  %v2172_v55 = vld [vmem:[%s1403_s15 + $0x5f8] sm:$0xff]  ;;  %v617_v18 = vadd.f32 %v616_v9, %v2139_v28  ;;  %v610_v30 = vsel %vm393_vm0, %v2165_v61, 0.0 }
  0x60   : > { %3179 = vst [vmem:[#allocation115_spill] sm:$0xff] %v2169_v23  ;;  %3180 = vst [vmem:[#allocation116_spill] sm:$0xff] %v2172_v55  ;;  %v2179_v34 = vld [vmem:[%s1403_s15 + $0x560] sm:$0xff]  ;;  %v2185_v19 = vld [vmem:[%s1403_s15 + $0x618] sm:$0xff]  ;;  %v632_v38 = vadd.f32 %v2169_v23, %v2158_v62  ;;  %v607_v60 = vadd.f32 %v606_v7, %v2155_v63  ;;  %v740_v23 = vmul.f32 %v1508_v20, %v1508_v20 }
  0x61   : > { %v2182_v6 = vld [vmem:[%s1403_s15 + $0x600] sm:$0xff]  ;;  %3182 = vst [vmem:[#allocation118_spill] sm:$0xff] %v2185_v19  ;;  %v2193_v32 = vld [vmem:[%s1403_s15 + $0x5b0] sm:$0xff]  ;;  %v2196_v5 = vld [vmem:[%s1403_s15 + $0x5b8] sm:$0xff]  ;;  %v2214_v62 = vadd.f32 %v984_v2, %v983_v15  ;;  %v593_v63 = vadd.f32 %v592_v12, %v591_v47  ;;  %v618_v20 = vadd.f32 %v617_v18, %v2152_v29  ;;  %v637_v2 = vsel %vm393_vm0, %v2185_v19, 0.0 }
  0x62   : > { %3181 = vst [vmem:[#allocation117_spill] sm:$0xff] %v2182_v6  ;;  %3183 = vst [vmem:[#allocation119_spill] sm:$0xff] %v2193_v32  ;;  %v2199_v26 = vld [vmem:[%s1403_s15 + $0x5c0] sm:$0xff]  ;;  %v2204_v49 = vld [vmem:[%s1403_s15 + $0x568] sm:$0xff]  ;;  %v633_v9 = vadd.f32 %v632_v38, %v2172_v55  ;;  %v623_v7 = vadd.f32 %v2196_v5, %v2193_v32  ;;  %v608_v10 = vadd.f32 %v607_v60, %v2179_v34 }
  0x63   : > { %3184 = vst [vmem:[#allocation120_spill] sm:$0xff] %v2196_v5  ;;  %3185 = vst [vmem:[#allocation121_spill] sm:$0xff] %v2199_v26  ;;  %v2209_v24 = vld [vmem:[%s1403_s15 + $0x608] sm:$0xff]  ;;  %v2222_v61 = vld [vmem:[%s1403_s15 + $0x658] sm:$0xff]  ;;  %v741_v38 = vmul.f32 %v1514_v25, %v1514_v25  ;;  %594 = vadd.xlane.f32.xlu0 %v593_v63  ;;  %v620_v25 = vadd.f32 %v619_v56, %v618_v20 }
  0x64   : > { %3186 = vst [vmem:[#allocation122_spill] sm:$0xff] %v2209_v24  ;;  %v2219_v28 = vld [vmem:[%s1403_s15 + $0x5c8] sm:$0xff]  ;;  %3188 = vst [vmem:[#allocation124_spill] sm:$0xff] %v2222_v61  ;;  %v2225_v59 = vld [vmem:[%s1403_s15 + $0x660] sm:$0xff]  ;;  %v634_v15 = vadd.f32 %v633_v9, %v2182_v6  ;;  %v624_v12 = vadd.f32 %v623_v7, %v2199_v26  ;;  %v609_v9 = vadd.f32 %v608_v10, %v2204_v49 }
  0x65   : > { %3187 = vst [vmem:[#allocation123_spill] sm:$0xff] %v2219_v28  ;;  %3189 = vst [vmem:[#allocation125_spill] sm:$0xff] %v2225_v59  ;;  %v2230_v5 = vld [vmem:[%s1403_s15 + $0x610] sm:$0xff]  ;;  %v2240_v18 = vld [vmem:[%s1403_s15 + $0x668] sm:$0xff]  ;;  %v650_v60 = vadd.f32 %v2225_v59, %v2222_v61  ;;  %v742_v7 = vmul.f32 %v1540_v51, %v1540_v51  ;;  %v970_v26 = vadd.f32 %v739_v33, %v738_v37  ;;  %621 = vadd.xlane.f32.xlu1 %v620_v25 }
  0x66   : > { %3190 = vst [vmem:[#allocation126_spill] sm:$0xff] %v2230_v5  ;;  %v2236_v47 = vld [vmem:[%s1403_s15 + $0x5d0] sm:$0xff]  ;;  %3192 = vst [vmem:[#allocation128_spill] sm:$0xff] %v2240_v18  ;;  %v2246_v32 = vld [vmem:[%s1403_s15 + $0x5e0] sm:$0xff]  ;;  %v635_v55 = vadd.f32 %v634_v15, %v2209_v24  ;;  %v625_v63 = vadd.f32 %v624_v12, %v2219_v28  ;;  %v744_v61 = vmul.f32 %v1517_v27, %v1517_v27 }
  0x67   : > { %3191 = vst [vmem:[#allocation127_spill] sm:$0xff] %v2236_v47  ;;  %3193 = vst [vmem:[#allocation129_spill] sm:$0xff] %v2246_v32  ;;  %v2249_v19 = vld [vmem:[%s1403_s15 + $0x670] sm:$0xff]  ;;  %v2252_v6 = vld [vmem:[%s1403_s15 + $0x620] sm:$0xff]  ;;  %v651_v20 = vadd.f32 %v650_v60, %v2240_v18  ;;  %v611_v51 = vadd.f32 %v610_v30, %v609_v9  ;;  %v743_v60 = vmul.f32 %v1558_v16, %v1558_v16  ;;  %v628_v30 = vsel %vm393_vm0, %v2246_v32, 0.0 }
  0x68   : > { %3194 = vst [vmem:[#allocation130_spill] sm:$0xff] %v2249_v19  ;;  %3195 = vst [vmem:[#allocation131_spill] sm:$0xff] %v2252_v6  ;;  %v2259_v56 = vld [vmem:[%s1403_s15 + $0x688] sm:$0xff]  ;;  %v2266_v59 = vld [vmem:[%s1403_s15 + $0x630] sm:$0xff]  ;;  %v971_v18 = vadd.f32 %v970_v26, %v740_v23  ;;  %v636_v27 = vadd.f32 %v635_v55, %v2230_v5  ;;  %v626_v25 = vadd.f32 %v625_v63, %v2236_v47 }
  0x69   : > { %3196 = vst [vmem:[#allocation132_spill] sm:$0xff] %v2259_v56  ;;  %v2263_v10 = vld [vmem:[%s1403_s15 + $0x628] sm:$0xff]  ;;  %3198 = vst [vmem:[#allocation134_spill] sm:$0xff] %v2266_v59  ;;  %v2271_v37 = vld [vmem:[%s1403_s15 + $0x5d8] sm:$0xff]  ;;  %v652_v9 = vadd.f32 %v651_v20, %v2249_v19  ;;  %612 = vadd.xlane.f32.xlu0 %v611_v51  ;;  %v655_v55 = vsel %vm393_vm0, %v2259_v56, 0.0 }
  0x6a   : > { %3197 = vst [vmem:[#allocation133_spill] sm:$0xff] %v2263_v10  ;;  %v2274_v33 = vld [vmem:[%s1403_s15 + $0x678] sm:$0xff]  ;;  %v641_v12 = vadd.f32 %v2263_v10, %v2252_v6  ;;  %v2289_v28 = vld [vmem:[%s1403_s15 + $0x6c8] sm:$0xff]  ;;  %v2292_v24 = vld [vmem:[%s1403_s15 + $0x6d0] sm:$0xff]  ;;  %v972_v6 = vadd.f32 %v971_v18, %v741_v38  ;;  %v638_v19 = vadd.f32 %v637_v2, %v636_v27  ;;  %v627_v51 = vadd.f32 %v626_v25, %v2271_v37 }
  0x6b   : > { %v2277_v15 = vld [vmem:[%s1403_s15 + $0x638] sm:$0xff]  ;;  %3199 = vst [vmem:[#allocation135_spill] sm:$0xff] %v2289_v28  ;;  %3200 = vst [vmem:[#allocation136_spill] sm:$0xff] %v2292_v24  ;;  %v2298_v16 = vld [vmem:[%s1403_s15 + $0x680] sm:$0xff]  ;;  %v668_v20 = vadd.f32 %v2292_v24, %v2289_v28  ;;  %v653_v47 = vadd.f32 %v652_v9, %v2274_v33  ;;  %v759_v27 = vmul.f32 %v1528_v44, %v1528_v44 }
  0x6c   : > { %v2295_v10 = vld [vmem:[%s1403_s15 + $0x6d8] sm:$0xff]  ;;  %v2303_v26 = vld [vmem:[%s1403_s15 + $0x640] sm:$0xff]  ;;  %v2306_v23 = vld [vmem:[%s1403_s15 + $0x650] sm:$0xff]  ;;  %v642_v63 = vadd.f32 %v641_v12, %v2266_v59  ;;  %v975_v12 = vsel %vm393_vm0, %v744_v61, 0.0  ;;  %639 = vadd.xlane.f32.xlu1 %v638_v19  ;;  %v629_v25 = vadd.f32 %v628_v30, %v627_v51 }
  0x6d   : > { %3201 = vst [vmem:[#allocation137_spill] sm:$0xff] %v2295_v10  ;;  %3202 = vst [vmem:[#allocation138_spill] sm:$0xff] %v2303_v26  ;;  %v2314_v56 = vld [vmem:[%s1403_s15 + $0x6e0] sm:$0xff]  ;;  %v2317_v32 = vld [vmem:[%s1403_s15 + $0x690] sm:$0xff]  ;;  %v669_v38 = vadd.f32 %v668_v20, %v2295_v10  ;;  %v654_v61 = vadd.f32 %v653_v47, %v2298_v16  ;;  %v973_v20 = vadd.f32 %v972_v6, %v742_v7  ;;  %v646_v44 = vsel %vm393_vm0, %v2306_v23, 0.0 }
  0x6e   : > { %3203 = vst [vmem:[#allocation139_spill] sm:$0xff] %v2317_v32  ;;  %v2320_v5 = vld [vmem:[%s1403_s15 + $0x698] sm:$0xff]  ;;  %v643_v59 = vadd.f32 %v642_v63, %v2277_v15  ;;  %v2329_v2 = vld [vmem:[%s1403_s15 + $0x6a0] sm:$0xff]  ;;  %v2337_v9 = vld [vmem:[%s1403_s15 + $0x648] sm:$0xff]  ;;  %630 = vadd.xlane.f32.xlu0 %v629_v25 }
  0x6f   : > { %3204 = vst [vmem:[#allocation140_spill] sm:$0xff] %v2320_v5  ;;  %v2325_v24 = vld [vmem:[%s1403_s15 + $0x6f8] sm:$0xff]  ;;  %3206 = vst [vmem:[#allocation142_spill] sm:$0xff] %v2329_v2  ;;  %v659_v18 = vadd.f32 %v2320_v5, %v2317_v32  ;;  %v2340_v63 = vld [vmem:[%s1403_s15 + $0x6e8] sm:$0xff]  ;;  %v760_v5 = vmul.f32 %v1531_v45, %v1531_v45  ;;  %v670_v19 = vadd.f32 %v669_v38, %v2314_v56 }
  0x70   : > { %3205 = vst [vmem:[#allocation141_spill] sm:$0xff] %v2325_v24  ;;  %3207 = vst [vmem:[#allocation143_spill] sm:$0xff] %v2340_v63  ;;  %v2343_v28 = vld [vmem:[%s1403_s15 + $0x6a8] sm:$0xff]  ;;  %v644_v32 = vadd.f32 %v643_v59, %v2303_v26  ;;  %v656_v30 = vadd.f32 %v655_v55, %v654_v61  ;;  %v2353_v51 = vld [vmem:[%s1403_s15 + $0x6f0] sm:$0xff]  ;;  %v673_v6 = vsel %vm393_vm0, %v2325_v24, 0.0  ;;  %v974_v45 = vadd.f32 %v973_v20, %v743_v60 }
  0x71   : > { %3208 = vst [vmem:[#allocation144_spill] sm:$0xff] %v2343_v28  ;;  %v660_v47 = vadd.f32 %v659_v18, %v2329_v2  ;;  %v2358_v7 = vld [vmem:[%s1403_s15 + $0x6b0] sm:$0xff]  ;;  %v761_v59 = vmul.f32 %v1534_v48, %v1534_v48  ;;  %v671_v10 = vadd.f32 %v670_v19, %v2340_v63  ;;  %v2365_v38 = vld [vmem:[%s1403_s15 + $0x6c0] sm:$0xff]  ;;  %v762_v55 = vmul.f32 %v1547_v0, %v1547_v0  ;;  %v2371_v25 = vld [vmem:[%s1403_s15 + $0x6b8] sm:$0xff] }
  0x72   : > { %v645_v26 = vadd.f32 %v644_v32, %v2337_v9  ;;  %3209 = vst [vmem:[#allocation145_spill] sm:$0xff] %v2365_v38  ;;  %657 = vadd.xlane.f32.xlu1 %v656_v30  ;;  %v2373_v61 = vadd.f32 %v975_v12, %v974_v45  ;;  %v3210_v60 = vld [vmem:[#allocation6_spill] sm:$0xff]  ;;  %v997_v48 = vadd.f32 %v760_v5, %v759_v27  ;;  %v664_v30 = vsel %vm393_vm0, %v2365_v38, 0.0  ;;  %v3213_v12 = vld [vmem:[#allocation4_spill] sm:$0xff]  ;;  %v3215_v27 = vld [vmem:[#allocation7_spill] sm:$0xff] }
  0x73   : > { %v661_v18 = vadd.f32 %v660_v47, %v2343_v28  ;;  %v765_v20 = vmul.f32 %v3210_v60, %v3210_v60  ;;  %v3211_v24 = vld [vmem:[#allocation2_spill] sm:$0xff]  ;;  %v672_v2 = vadd.f32 %v671_v10, %v2353_v51  ;;  %v3212_v28 = vld [vmem:[#allocation3_spill] sm:$0xff]  ;;  %v763_v45 = vmul.f32 %v3213_v12, %v3213_v12  ;;  %v3214_v60 = vld [vmem:[#allocation5_spill] sm:$0xff] }
  0x74   : > { %v752_v32 = vmul.f32 %v3211_v24, %v3211_v24  ;;  %v647_v19 = vadd.f32 %v646_v44, %v645_v26  ;;  %v753_v0 = vmul.f32 %v3212_v28, %v3212_v28  ;;  %v998_v63 = vadd.f32 %v997_v48, %v761_v59  ;;  %v3216_v12 = vld [vmem:[#allocation8_spill] sm:$0xff] }
  0x75   : > { %v662_v47 = vadd.f32 %v661_v18, %v2358_v7  ;;  %v754_v5 = vmul.f32 %v3214_v60, %v3214_v60  ;;  %v674_v24 = vadd.f32 %v673_v6, %v672_v2  ;;  %v764_v10 = vmul.f32 %v1585_v53, %v1585_v53  ;;  %v3217_v6 = vld [vmem:[#allocation9_spill] sm:$0xff] }
  0x76   : > { %648 = vadd.xlane.f32.xlu0 %v647_v19  ;;  %v755_v28 = vmul.f32 %v3215_v27, %v3215_v27  ;;  %v999_v44 = vadd.f32 %v998_v63, %v762_v55  ;;  %v758_v18 = vmul.f32 %v1600_v58, %v1600_v58  ;;  %v988_v38 = vadd.f32 %v753_v0, %v752_v32  ;;  %v3219_v27 = vld [vmem:[#allocation11_spill] sm:$0xff]  ;;  %v3220_v0 = vld [vmem:[#allocation12_spill] sm:$0xff] }
  0x77   : > { %v663_v26 = vadd.f32 %v662_v47, %v2371_v25  ;;  %v773_v59 = vmul.f32 %v3216_v12, %v3216_v12  ;;  %675 = vadd.xlane.f32.xlu1 %v674_v24  ;;  %v1002_v2 = vsel %vm393_vm0, %v765_v20, 0.0  ;;  %v774_v19 = vmul.f32 %v3217_v6, %v3217_v6  ;;  %v3218_v47 = vld [vmem:[#allocation10_spill] sm:$0xff]  ;;  %v3221_v24 = vld [vmem:[#allocation13_spill] sm:$0xff] }
  0x78   : > { %v775_v53 = vmul.f32 %v3218_v47, %v3218_v47  ;;  %v1000_v60 = vadd.f32 %v999_v44, %v763_v45  ;;  %v756_v63 = vmul.f32 %v3219_v27, %v3219_v27  ;;  %v757_v58 = vmul.f32 %v1623_v41, %v1623_v41  ;;  %v3222_v44 = vld [vmem:[#allocation14_spill] sm:$0xff]  ;;  %v3226_v27 = vld [vmem:[#allocation24_spill] sm:$0xff] }
  0x79   : > { %v665_v48 = vadd.f32 %v664_v30, %v663_v26  ;;  %v989_v55 = vadd.f32 %v988_v38, %v754_v5  ;;  %v993_v32 = vsel %vm393_vm0, %v758_v18, 0.0  ;;  %v776_v20 = vmul.f32 %v3220_v0, %v3220_v0  ;;  %v3223_v18 = vld [vmem:[#allocation15_spill] sm:$0xff] }
  0x7a   : > { %v1015_v30 = vadd.f32 %v774_v19, %v773_v59  ;;  %v766_v26 = vmul.f32 %v3221_v24, %v3221_v24  ;;  %v1001_v12 = vadd.f32 %v1000_v60, %v764_v10  ;;  %v779_v45 = vmul.f32 %v1629_v43, %v1629_v43  ;;  %v3225_v19 = vld [vmem:[#allocation20_spill] sm:$0xff] }
  0x7b   : > { %666 = vadd.xlane.f32.xlu0 %v665_v48  ;;  %v990_v6 = vadd.f32 %v989_v55, %v755_v28  ;;  %v767_v47 = vmul.f32 %v3222_v44, %v3222_v44  ;;  %950 = vadd.xlane.f32.xlu1 %v1677_v4  ;;  %v777_v41 = vmul.f32 %v1626_v40, %v1626_v40  ;;  %v3224_v48 = vld [vmem:[#allocation16_spill] sm:$0xff]  ;;  %v3227_v40 = vld [vmem:[#allocation17_spill] sm:$0xff] }
  0x7c   : > { %v778_v38 = vmul.f32 %v1639_v1, %v1639_v1  ;;  %v1016_v5 = vadd.f32 %v1015_v30, %v775_v53  ;;  %v768_v59 = vmul.f32 %v3223_v18, %v3223_v18  ;;  %v1003_v10 = vadd.f32 %v1002_v2, %v1001_v12  ;;  %v3228_v1 = vld [vmem:[#allocation18_spill] sm:$0xff]  ;;  %v3230_v12 = vld [vmem:[#allocation21_spill] sm:$0xff] }
  0x7d   : > { %v991_v28 = vadd.f32 %v990_v6, %v756_v63  ;;  %v769_v43 = vmul.f32 %v3224_v48, %v3224_v48  ;;  %v772_v60 = vmul.f32 %v3225_v19, %v3225_v19  ;;  %v1006_v55 = vadd.f32 %v767_v47, %v766_v26  ;;  %v3229_v63 = vld [vmem:[#allocation19_spill] sm:$0xff]  ;;  %v3231_v18 = vld [vmem:[#allocation22_spill] sm:$0xff] }
  0x7e   : > { %v1017_v4 = vadd.f32 %v1016_v5, %v776_v20  ;;  %v787_v0 = vmul.f32 %v3227_v40, %v3227_v40  ;;  %v788_v53 = vmul.f32 %v3228_v1, %v3228_v1  ;;  %v1020_v2 = vsel %vm393_vm0, %v779_v45, 0.0 }
  0x7f   : > { %941 = vadd.xlane.f32.xlu0 %v3226_v27  ;;  %v992_v30 = vadd.f32 %v991_v28, %v757_v58  ;;  %v770_v24 = vmul.f32 %v3229_v63, %v3229_v63  ;;  %v789_v6 = vmul.f32 %v3230_v12, %v3230_v12  ;;  %968 = vadd.xlane.f32.xlu1 %v1922_v54  ;;  %v1011_v47 = vsel %vm393_vm0, %v772_v60, 0.0  ;;  %v3232_v28 = vld [vmem:[#allocation23_spill] sm:$0xff]  ;;  %v3233_v54 = vld [vmem:[#allocation25_spill] sm:$0xff]  ;;  %v3236_v60 = vld [vmem:[#allocation34_spill] sm:$0xff] }
  0x80   : > { %v1018_v44 = vadd.f32 %v1017_v4, %v777_v41  ;;  %v771_v20 = vmul.f32 %v1669_v11, %v1669_v11  ;;  %v1007_v26 = vadd.f32 %v1006_v55, %v768_v59  ;;  %v790_v58 = vmul.f32 %v3231_v18, %v3231_v18  ;;  %v3234_v4 = vld [vmem:[#allocation26_spill] sm:$0xff]  ;;  %v3235_v59 = vld [vmem:[#allocation28_spill] sm:$0xff] }
  0x81   : > { %v994_v5 = vadd.f32 %v993_v32, %v992_v30  ;;  %v1033_v45 = vadd.f32 %v788_v53, %v787_v0  ;;  %v780_v48 = vmul.f32 %v3232_v28, %v3232_v28  ;;  %v793_v41 = vmul.f32 %v3233_v54, %v3233_v54  ;;  %v3237_v0 = vld [vmem:[#allocation27_spill] sm:$0xff]  ;;  %v3239_v30 = vld [vmem:[#allocation30_spill] sm:$0xff]  ;;  %v3241_v28 = vld [vmem:[#allocation32_spill] sm:$0xff] }
  0x82   : > { %v1019_v19 = vadd.f32 %v1018_v44, %v778_v38  ;;  %v1008_v27 = vadd.f32 %v1007_v26, %v769_v43  ;;  %v781_v11 = vmul.f32 %v3234_v4, %v3234_v4  ;;  %v791_v32 = vmul.f32 %v3235_v59, %v3235_v59  ;;  %v3238_v43 = vld [vmem:[#allocation29_spill] sm:$0xff]  ;;  %v3240_v26 = vld [vmem:[#allocation31_spill] sm:$0xff] }
  0x83   : > { %959 = vadd.xlane.f32.xlu0 %v1996_v57  ;;  %v792_v55 = vmul.f32 %v3236_v60, %v3236_v60  ;;  %v1034_v40 = vadd.f32 %v1033_v45, %v789_v6  ;;  %v782_v1 = vmul.f32 %v3237_v0, %v3237_v0  ;;  %986 = vadd.xlane.f32.xlu1 %v2214_v62  ;;  %v1038_v62 = vsel %vm393_vm0, %v793_v41, 0.0  ;;  %v3245_v60 = vld [vmem:[#allocation36_spill] sm:$0xff]  ;;  %v3246_v41 = vld [vmem:[#allocation37_spill] sm:$0xff] }
  0x84   : > { %v1021_v57 = vadd.f32 %v1020_v2, %v1019_v19  ;;  %v1009_v38 = vadd.f32 %v1008_v27, %v770_v24  ;;  %v783_v53 = vmul.f32 %v3238_v43, %v3238_v43  ;;  %v786_v63 = vmul.f32 %v3239_v30, %v3239_v30  ;;  %v3242_v2 = vld [vmem:[#allocation35_spill] sm:$0xff]  ;;  %v3243_v19 = vld [vmem:[#allocation33_spill] sm:$0xff]  ;;  %v3247_v43 = vld [vmem:[#allocation42_spill] sm:$0xff] }
  0x85   : > { %v1035_v12 = vadd.f32 %v1034_v40, %v790_v58  ;;  %v1024_v44 = vadd.f32 %v781_v11, %v780_v48  ;;  %v801_v18 = vmul.f32 %v3240_v26, %v3240_v26  ;;  %v802_v6 = vmul.f32 %v3241_v28, %v3241_v28  ;;  %v3244_v58 = vld [vmem:[#allocation39_spill] sm:$0xff]  ;;  %v3248_v30 = vld [vmem:[#allocation38_spill] sm:$0xff] }
  0x86   : > { %v1010_v45 = vadd.f32 %v1009_v38, %v771_v20  ;;  %v784_v24 = vmul.f32 %v3242_v2, %v3242_v2  ;;  %v803_v27 = vmul.f32 %v3243_v19, %v3243_v19  ;;  %v785_v48 = vmul.f32 %v3244_v58, %v3244_v58  ;;  %v3252_v2 = vld [vmem:[#allocation44_spill] sm:$0xff] }
  0x87   : > { %977 = vadd.xlane.f32.xlu0 %v2373_v61  ;;  %v1036_v54 = vadd.f32 %v1035_v12, %v791_v32  ;;  %v1025_v4 = vadd.f32 %v1024_v44, %v782_v1  ;;  %v1029_v11 = vsel %vm393_vm0, %v786_v63, 0.0  ;;  %1004 = vadd.xlane.f32.xlu1 %v1003_v10  ;;  %v804_v61 = vmul.f32 %v3245_v60, %v3245_v60  ;;  %v3249_v1 = vld [vmem:[#allocation40_spill] sm:$0xff]  ;;  %v3250_v44 = vld [vmem:[#allocation41_spill] sm:$0xff] }
  0x88   : > { %v1012_v59 = vadd.f32 %v1011_v47, %v1010_v45  ;;  %v1051_v20 = vadd.f32 %v802_v6, %v801_v18  ;;  %v794_v40 = vmul.f32 %v3246_v41, %v3246_v41  ;;  %v807_v32 = vmul.f32 %v3247_v43, %v3247_v43  ;;  %v3255_v41 = vld [vmem:[#allocation47_spill] sm:$0xff] }
  0x89   : > { %v1037_v0 = vadd.f32 %v1036_v54, %v792_v55  ;;  %v1026_v38 = vadd.f32 %v1025_v4, %v783_v53  ;;  %v795_v12 = vmul.f32 %v3248_v30, %v3248_v30  ;;  %v805_v10 = vmul.f32 %v3249_v1, %v3249_v1  ;;  %v3251_v53 = vld [vmem:[#allocation43_spill] sm:$0xff]  ;;  %v3253_v54 = vld [vmem:[#allocation45_spill] sm:$0xff] }
  0x8a   : > { %v806_v47 = vmul.f32 %v1779_v35, %v1779_v35  ;;  %v1052_v63 = vadd.f32 %v1051_v20, %v803_v27  ;;  %v796_v26 = vmul.f32 %v3250_v44, %v3250_v44  ;;  %v797_v28 = vmul.f32 %v3251_v53, %v3251_v53  ;;  %v3258_v30 = vld [vmem:[#allocation51_spill] sm:$0xff] }
  0x8b   : > { %995 = vadd.xlane.f32.xlu0 %v994_v5  ;;  %v1039_v18 = vadd.f32 %v1038_v62, %v1037_v0  ;;  %v1027_v55 = vadd.f32 %v1026_v38, %v784_v24  ;;  %v800_v6 = vmul.f32 %v1795_v3, %v1795_v3  ;;  %1022 = vadd.xlane.f32.xlu1 %v1021_v57  ;;  %v1056_v58 = vsel %vm393_vm0, %v807_v32, 0.0  ;;  %v3254_v24 = vld [vmem:[#allocation46_spill] sm:$0xff]  ;;  %v3256_v0 = vld [vmem:[#allocation48_spill] sm:$0xff]  ;;  %v3257_v32 = vld [vmem:[#allocation49_spill] sm:$0xff] }
  0x8c   : > { %v1053_v5 = vadd.f32 %v1052_v63, %v804_v61  ;;  %v1042_v45 = vadd.f32 %v795_v12, %v794_v40  ;;  %v815_v19 = vmul.f32 %v3252_v2, %v3252_v2  ;;  %v816_v35 = vmul.f32 %v3253_v54, %v3253_v54  ;;  %v3264_v54 = vld [vmem:[#allocation55_spill] sm:$0xff] }
  0x8d   : > { %v1028_v27 = vadd.f32 %v1027_v55, %v785_v48  ;;  %v798_v62 = vmul.f32 %v1792_v13, %v1792_v13  ;;  %v817_v4 = vmul.f32 %v3254_v24, %v3254_v24  ;;  %v799_v57 = vmul.f32 %v1819_v36, %v1819_v36 }
  0x8e   : > { %v1054_v3 = vadd.f32 %v1053_v5, %v805_v10  ;;  %v1043_v60 = vadd.f32 %v1042_v45, %v796_v26  ;;  %v1047_v61 = vsel %vm393_vm0, %v800_v6, 0.0  ;;  %v818_v48 = vmul.f32 %v3255_v41, %v3255_v41  ;;  %v3259_v10 = vld [vmem:[#allocation50_spill] sm:$0xff]  ;;  %v3260_v26 = vld [vmem:[#allocation52_spill] sm:$0xff]  ;;  %v3262_v6 = vld [vmem:[#allocation53_spill] sm:$0xff] }
  0x8f   : > { %1013 = vadd.xlane.f32.xlu0 %v1012_v59  ;;  %v1030_v20 = vadd.f32 %v1029_v11, %v1028_v27  ;;  %v1069_v40 = vadd.f32 %v816_v35, %v815_v19  ;;  %v808_v38 = vmul.f32 %v3256_v0, %v3256_v0  ;;  %1040 = vadd.xlane.f32.xlu1 %v1039_v18  ;;  %v3263_v45 = vld [vmem:[#allocation54_spill] sm:$0xff]  ;;  %v3265_v27 = vld [vmem:[#allocation56_spill] sm:$0xff] }
  0x90   : > { %v1055_v13 = vadd.f32 %v1054_v3, %v806_v47  ;;  %v1044_v43 = vadd.f32 %v1043_v60, %v797_v28  ;;  %v821_v59 = vmul.f32 %v1825_v52, %v1825_v52  ;;  %v809_v36 = vmul.f32 %v3257_v32, %v3257_v32  ;;  %v3261_v52 = vld [vmem:[#allocation57_spill] sm:$0xff] }
  0x91   : > { %v819_v12 = vmul.f32 %v3258_v30, %v3258_v30  ;;  %v820_v11 = vmul.f32 %v1846_v46, %v1846_v46  ;;  %v1070_v1 = vadd.f32 %v1069_v40, %v817_v4  ;;  %v810_v63 = vmul.f32 %v3259_v10, %v3259_v10 }
  0x92   : > { %v1057_v44 = vadd.f32 %v1056_v58, %v1055_v13  ;;  %v1045_v47 = vadd.f32 %v1044_v43, %v798_v62  ;;  %v811_v18 = vmul.f32 %v3260_v26, %v3260_v26  ;;  %v814_v55 = vmul.f32 %v3261_v52, %v3261_v52  ;;  %v3268_v43 = vld [vmem:[#allocation60_spill] sm:$0xff]  ;;  %v3272_v26 = vld [vmem:[#allocation63_spill] sm:$0xff] }
  0x93   : > { %1031 = vadd.xlane.f32.xlu0 %v1030_v20  ;;  %v1071_v53 = vadd.f32 %v1070_v1, %v818_v48  ;;  %v1060_v28 = vadd.f32 %v809_v36, %v808_v38  ;;  %v829_v5 = vmul.f32 %v3262_v6, %v3262_v6  ;;  %v830_v46 = vmul.f32 %v3263_v45, %v3263_v45  ;;  %v3266_v20 = vld [vmem:[#allocation58_spill] sm:$0xff]  ;;  %v3267_v48 = vld [vmem:[#allocation59_spill] sm:$0xff]  ;;  %v3269_v36 = vld [vmem:[#allocation61_spill] sm:$0xff] }
  0x94   : > { %1058 = vadd.xlane.f32.xlu1 %v1057_v44  ;;  %v1046_v2 = vadd.f32 %v1045_v47, %v799_v57  ;;  %v1074_v19 = vsel %vm393_vm0, %v821_v59, 0.0  ;;  %v812_v35 = vmul.f32 %v3264_v54, %v3264_v54  ;;  %v831_v58 = vmul.f32 %v3265_v27, %v3265_v27  ;;  %v3270_v1 = vld [vmem:[#allocation62_spill] sm:$0xff]  ;;  %v3275_v6 = vld [vmem:[#allocation65_spill] sm:$0xff] }
  0x95   : > { %v1072_v62 = vadd.f32 %v1071_v53, %v819_v12  ;;  %v813_v24 = vmul.f32 %v1874_v42, %v1874_v42  ;;  %v1061_v4 = vadd.f32 %v1060_v28, %v810_v63  ;;  %v1065_v3 = vsel %vm393_vm0, %v814_v55, 0.0  ;;  %v3274_v53 = vld [vmem:[#allocation66_spill] sm:$0xff] }
  0x96   : > { %v1048_v60 = vadd.f32 %v1047_v61, %v1046_v2  ;;  %v832_v41 = vmul.f32 %v3266_v20, %v3266_v20  ;;  %v1087_v57 = vadd.f32 %v830_v46, %v829_v5  ;;  %v822_v40 = vmul.f32 %v3267_v48, %v3267_v48  ;;  %v3278_v20 = vld [vmem:[#allocation72_spill] sm:$0xff] }
  0x97   : > { %v1073_v0 = vadd.f32 %v1072_v62, %v820_v11  ;;  %v1062_v38 = vadd.f32 %v1061_v4, %v811_v18  ;;  %v835_v13 = vmul.f32 %v1888_v22, %v1888_v22  ;;  %v823_v59 = vmul.f32 %v3268_v43, %v3268_v43  ;;  %v3271_v22 = vld [vmem:[#allocation67_spill] sm:$0xff]  ;;  %v3273_v18 = vld [vmem:[#allocation64_spill] sm:$0xff]  ;;  %v3277_v62 = vld [vmem:[#allocation69_spill] sm:$0xff] }
  0x98   : > { %1049 = vadd.xlane.f32.xlu0 %v1048_v60  ;;  %v833_v42 = vmul.f32 %v1885_v21, %v1885_v21  ;;  %v834_v61 = vmul.f32 %v1911_v14, %v1911_v14  ;;  %v1088_v32 = vadd.f32 %v1087_v57, %v831_v58  ;;  %v824_v30 = vmul.f32 %v3269_v36, %v3269_v36  ;;  %v3279_v57 = vld [vmem:[#allocation70_spill] sm:$0xff]  ;;  %v3284_v36 = vld [vmem:[#allocation77_spill] sm:$0xff] }
  0x99   : > { %v1075_v12 = vadd.f32 %v1074_v19, %v1073_v0  ;;  %v1063_v11 = vadd.f32 %v1062_v38, %v812_v35  ;;  %v825_v10 = vmul.f32 %v3270_v1, %v3270_v1  ;;  %v828_v63 = vmul.f32 %v3271_v22, %v3271_v22  ;;  %v3276_v35 = vld [vmem:[#allocation68_spill] sm:$0xff]  ;;  %v3286_v22 = vld [vmem:[#allocation78_spill] sm:$0xff] }
  0x9a   : > { %v1089_v44 = vadd.f32 %v1088_v32, %v832_v41  ;;  %v1078_v47 = vadd.f32 %v823_v59, %v822_v40  ;;  %v843_v21 = vmul.f32 %v3272_v26, %v3272_v26  ;;  %v844_v14 = vmul.f32 %v3273_v18, %v3273_v18  ;;  %v3285_v1 = vld [vmem:[#allocation76_spill] sm:$0xff]  ;;  %v3288_v18 = vld [vmem:[#allocation79_spill] sm:$0xff] }
  0x9b   : > { %1076 = vadd.xlane.f32.xlu1 %v1075_v12  ;;  %v1064_v52 = vadd.f32 %v1063_v11, %v813_v24  ;;  %v1092_v55 = vsel %vm393_vm0, %v835_v13, 0.0  ;;  %v826_v28 = vmul.f32 %v3274_v53, %v3274_v53  ;;  %v845_v5 = vmul.f32 %v3275_v6, %v3275_v6  ;;  %v3282_v13 = vld [vmem:[#allocation73_spill] sm:$0xff]  ;;  %v3287_v26 = vld [vmem:[#allocation80_spill] sm:$0xff] }
  0x9c   : > { %v1090_v45 = vadd.f32 %v1089_v44, %v833_v42  ;;  %v827_v46 = vmul.f32 %v1928_v8, %v1928_v8  ;;  %v1079_v2 = vadd.f32 %v1078_v47, %v824_v30  ;;  %v1083_v19 = vsel %vm393_vm0, %v828_v63, 0.0  ;;  %v3280_v8 = vld [vmem:[#allocation71_spill] sm:$0xff] }
  0x9d   : > { %v1066_v54 = vadd.f32 %v1065_v3, %v1064_v52  ;;  %v846_v27 = vmul.f32 %v3276_v35, %v3276_v35  ;;  %v1105_v58 = vadd.f32 %v844_v14, %v843_v21  ;;  %v836_v24 = vmul.f32 %v3277_v62, %v3277_v62  ;;  %v3281_v3 = vld [vmem:[#allocation74_spill] sm:$0xff] }
  0x9e   : > { %v1091_v4 = vadd.f32 %v1090_v45, %v834_v61  ;;  %v1080_v60 = vadd.f32 %v1079_v2, %v825_v10  ;;  %v849_v41 = vmul.f32 %v3278_v20, %v3278_v20  ;;  %v837_v48 = vmul.f32 %v3279_v57, %v3279_v57  ;;  %v3283_v61 = vld [vmem:[#allocation75_spill] sm:$0xff]  ;;  %v3290_v45 = vld [vmem:[#allocation81_spill] sm:$0xff]  ;;  %v3292_v62 = vld [vmem:[#allocation82_spill] sm:$0xff] }
  0x9f   : > { %1067 = vadd.xlane.f32.xlu0 %v1066_v54  ;;  %v847_v40 = vmul.f32 %v3280_v8, %v3280_v8  ;;  %v848_v0 = vmul.f32 %v3281_v3, %v3281_v3  ;;  %v1106_v38 = vadd.f32 %v1105_v58, %v845_v5  ;;  %v838_v43 = vmul.f32 %v3282_v13, %v3282_v13  ;;  %v3291_v54 = vld [vmem:[#allocation83_spill] sm:$0xff]  ;;  %v3297_v13 = vld [vmem:[#allocation93_spill] sm:$0xff] }
  0xa0   : > { %v1093_v59 = vadd.f32 %v1092_v55, %v1091_v4  ;;  %v1081_v42 = vadd.f32 %v1080_v60, %v826_v28  ;;  %v839_v32 = vmul.f32 %v3283_v61, %v3283_v61  ;;  %v842_v30 = vmul.f32 %v3284_v36, %v3284_v36  ;;  %v3289_v55 = vld [vmem:[#allocation86_spill] sm:$0xff]  ;;  %v3293_v4 = vld [vmem:[#allocation84_spill] sm:$0xff] }
  0xa1   : > { %v1107_v12 = vadd.f32 %v1106_v38, %v846_v27  ;;  %v1096_v11 = vadd.f32 %v837_v48, %v836_v24  ;;  %v857_v10 = vmul.f32 %v3285_v1, %v3285_v1  ;;  %v858_v63 = vmul.f32 %v3286_v22, %v3286_v22  ;;  %v3295_v48 = vld [vmem:[#allocation85_spill] sm:$0xff]  ;;  %v3298_v61 = vld [vmem:[#allocation88_spill] sm:$0xff] }
  0xa2   : > { %1094 = vadd.xlane.f32.xlu1 %v1093_v59  ;;  %v1082_v44 = vadd.f32 %v1081_v42, %v827_v46  ;;  %v1110_v47 = vsel %vm393_vm0, %v849_v41, 0.0  ;;  %v840_v21 = vmul.f32 %v3287_v26, %v3287_v26  ;;  %v859_v14 = vmul.f32 %v3288_v18, %v3288_v18  ;;  %v3302_v18 = vld [vmem:[#allocation94_spill] sm:$0xff] }
  0xa3   : > { %v1108_v52 = vadd.f32 %v1107_v12, %v847_v40  ;;  %v841_v53 = vmul.f32 %v3289_v55, %v3289_v55  ;;  %v1097_v28 = vadd.f32 %v1096_v11, %v838_v43  ;;  %v1101_v6 = vsel %vm393_vm0, %v842_v30, 0.0  ;;  %v3300_v11 = vld [vmem:[#allocation91_spill] sm:$0xff] }
  0xa4   : > { %v1084_v5 = vadd.f32 %v1083_v19, %v1082_v44  ;;  %v860_v2 = vmul.f32 %v3290_v45, %v3290_v45  ;;  %v1123_v46 = vadd.f32 %v858_v63, %v857_v10  ;;  %v850_v35 = vmul.f32 %v3291_v54, %v3291_v54  ;;  %v3294_v19 = vld [vmem:[#allocation90_spill] sm:$0xff]  ;;  %v3301_v10 = vld [vmem:[#allocation92_spill] sm:$0xff]  ;;  %v3303_v55 = vld [vmem:[#allocation95_spill] sm:$0xff] }
  0xa5   : > { %v1109_v27 = vadd.f32 %v1108_v52, %v848_v0  ;;  %v1098_v58 = vadd.f32 %v1097_v28, %v839_v32  ;;  %v863_v24 = vmul.f32 %v3292_v62, %v3292_v62  ;;  %v851_v60 = vmul.f32 %v3293_v4, %v3293_v4  ;;  %v3296_v0 = vld [vmem:[#allocation87_spill] sm:$0xff]  ;;  %v3299_v32 = vld [vmem:[#allocation89_spill] sm:$0xff]  ;;  %v3304_v45 = vld [vmem:[#allocation96_spill] sm:$0xff] }
  0xa6   : > { %1085 = vadd.xlane.f32.xlu0 %v1084_v5  ;;  %v861_v20 = vmul.f32 %v2018_v17, %v2018_v17  ;;  %v862_v41 = vmul.f32 %v3294_v19, %v3294_v19  ;;  %v1124_v57 = vadd.f32 %v1123_v46, %v859_v14  ;;  %v852_v8 = vmul.f32 %v3295_v48, %v3295_v48  ;;  %v3305_v46 = vld [vmem:[#allocation97_spill] sm:$0xff] }
  0xa7   : > { %v1111_v40 = vadd.f32 %v1110_v47, %v1109_v27  ;;  %v1099_v3 = vadd.f32 %v1098_v58, %v840_v21  ;;  %v853_v38 = vmul.f32 %v3296_v0, %v3296_v0  ;;  %v856_v43 = vmul.f32 %v3297_v13, %v3297_v13  ;;  %v3307_v58 = vld [vmem:[#allocation98_spill] sm:$0xff]  ;;  %v3309_v19 = vld [vmem:[#allocation101_spill] sm:$0xff] }
  0xa8   : > { %v1125_v59 = vadd.f32 %v1124_v57, %v860_v2  ;;  %v1114_v42 = vadd.f32 %v851_v60, %v850_v35  ;;  %v871_v17 = vmul.f32 %v3298_v61, %v3298_v61  ;;  %v872_v36 = vmul.f32 %v3299_v32, %v3299_v32  ;;  %v3308_v60 = vld [vmem:[#allocation100_spill] sm:$0xff]  ;;  %v3313_v61 = vld [vmem:[#allocation105_spill] sm:$0xff] }
  0xa9   : > { %1112 = vadd.xlane.f32.xlu1 %v1111_v40  ;;  %v1100_v30 = vadd.f32 %v1099_v3, %v841_v53  ;;  %v1128_v12 = vsel %vm393_vm0, %v863_v24, 0.0  ;;  %v854_v1 = vmul.f32 %v3300_v11, %v3300_v11  ;;  %v873_v22 = vmul.f32 %v3301_v10, %v3301_v10  ;;  %v3311_v3 = vld [vmem:[#allocation103_spill] sm:$0xff] }
  0xaa   : > { %v1126_v63 = vadd.f32 %v1125_v59, %v861_v20  ;;  %v855_v44 = vmul.f32 %v2055_v31, %v2055_v31  ;;  %v1115_v47 = vadd.f32 %v1114_v42, %v852_v8  ;;  %v1119_v26 = vsel %vm393_vm0, %v856_v43, 0.0  ;;  %v3306_v31 = vld [vmem:[#allocation99_spill] sm:$0xff]  ;;  %v3310_v8 = vld [vmem:[#allocation102_spill] sm:$0xff]  ;;  %v3312_v43 = vld [vmem:[#allocation104_spill] sm:$0xff] }
  0xab   : > { %v1102_v21 = vadd.f32 %v1101_v6, %v1100_v30  ;;  %v874_v14 = vmul.f32 %v3302_v18, %v3302_v18  ;;  %v1141_v52 = vadd.f32 %v872_v36, %v871_v17  ;;  %v864_v53 = vmul.f32 %v3303_v55, %v3303_v55  ;;  %v3315_v10 = vld [vmem:[#allocation107_spill] sm:$0xff] }
  0xac   : > { %v1127_v28 = vadd.f32 %v1126_v63, %v862_v41  ;;  %v1116_v5 = vadd.f32 %v1115_v47, %v853_v38  ;;  %v877_v2 = vmul.f32 %v3304_v45, %v3304_v45  ;;  %v865_v54 = vmul.f32 %v3305_v46, %v3305_v46 }
  0xad   : > { %1103 = vadd.xlane.f32.xlu0 %v1102_v21  ;;  %v875_v35 = vmul.f32 %v3306_v31, %v3306_v31  ;;  %v876_v6 = vmul.f32 %v2110_v50, %v2110_v50  ;;  %v1142_v27 = vadd.f32 %v1141_v52, %v873_v22  ;;  %v866_v62 = vmul.f32 %v3307_v58, %v3307_v58  ;;  %v3317_v21 = vld [vmem:[#allocation108_spill] sm:$0xff] }
  0xae   : > { %v1129_v24 = vadd.f32 %v1128_v12, %v1127_v28  ;;  %v1117_v4 = vadd.f32 %v1116_v5, %v854_v1  ;;  %v867_v20 = vmul.f32 %v3308_v60, %v3308_v60  ;;  %v870_v41 = vmul.f32 %v3309_v19, %v3309_v19  ;;  %v3314_v12 = vld [vmem:[#allocation106_spill] sm:$0xff] }
  0xaf   : > { %v1143_v57 = vadd.f32 %v1142_v27, %v874_v14  ;;  %v1132_v48 = vadd.f32 %v865_v54, %v864_v53  ;;  %v885_v40 = vmul.f32 %v3310_v8, %v3310_v8  ;;  %v886_v50 = vmul.f32 %v3311_v3, %v3311_v3  ;;  %v3318_v14 = vld [vmem:[#allocation109_spill] sm:$0xff]  ;;  %v3319_v53 = vld [vmem:[#allocation111_spill] sm:$0xff]  ;;  %v3321_v54 = vld [vmem:[#allocation114_spill] sm:$0xff] }
  0xb0   : > { %1130 = vadd.xlane.f32.xlu1 %v1129_v24  ;;  %v1118_v0 = vadd.f32 %v1117_v4, %v855_v44  ;;  %v1146_v38 = vsel %vm393_vm0, %v877_v2, 0.0  ;;  %v868_v13 = vmul.f32 %v2115_v39, %v2115_v39  ;;  %v887_v59 = vmul.f32 %v3312_v43, %v3312_v43  ;;  %v3316_v44 = vld [vmem:[#allocation110_spill] sm:$0xff]  ;;  %v3320_v2 = vld [vmem:[#allocation112_spill] sm:$0xff]  ;;  %v3322_v27 = vld [vmem:[#allocation113_spill] sm:$0xff] }
  0xb1   : > { %v1144_v42 = vadd.f32 %v1143_v57, %v875_v35  ;;  %v869_v17 = vmul.f32 %v3313_v61, %v3313_v61  ;;  %v1133_v32 = vadd.f32 %v1132_v48, %v866_v62  ;;  %v1137_v36 = vsel %vm393_vm0, %v870_v41, 0.0  ;;  %v3323_v62 = vld [vmem:[#allocation115_spill] sm:$0xff]  ;;  %v3325_v3 = vld [vmem:[#allocation117_spill] sm:$0xff]  ;;  %v3328_v61 = vld [vmem:[#allocation120_spill] sm:$0xff] }
  0xb2   : > { %v1120_v30 = vadd.f32 %v1119_v26, %v1118_v0  ;;  %v888_v11 = vmul.f32 %v3314_v12, %v3314_v12  ;;  %v1159_v1 = vadd.f32 %v886_v50, %v885_v40  ;;  %v878_v22 = vmul.f32 %v3315_v10, %v3315_v10  ;;  %v2698_v10 = vpop.xlane.xlu1 %414 }
  0xb3   : > { %v1145_v63 = vadd.f32 %v1144_v42, %v876_v6  ;;  %v1134_v39 = vadd.f32 %v1133_v32, %v867_v20  ;;  %v891_v47 = vmul.f32 %v3316_v44, %v3316_v44  ;;  %v879_v18 = vmul.f32 %v3317_v21, %v3317_v21  ;;  %v3324_v20 = vld [vmem:[#allocation116_spill] sm:$0xff]  ;;  %680 = vst.msk [vmem:[%s2764_s19 + $0x10] sm:$0xff] %vm677_vm1, %v2698_v10 }
  0xb4   : > { %1121 = vadd.xlane.f32.xlu0 %v1120_v30  ;;  %v889_v52 = vmul.f32 %v3318_v14, %v3318_v14  ;;  %v890_v26 = vmul.f32 %v2152_v29, %v2152_v29  ;;  %v1160_v55 = vadd.f32 %v1159_v1, %v887_v59  ;;  %v880_v28 = vmul.f32 %v3319_v53, %v3319_v53  ;;  %v3327_v59 = vld [vmem:[#allocation118_spill] sm:$0xff] }
  0xb5   : > { %v1147_v5 = vadd.f32 %v1146_v38, %v1145_v63  ;;  %v1135_v45 = vadd.f32 %v1134_v39, %v868_v13  ;;  %v881_v46 = vmul.f32 %v3320_v2, %v3320_v2  ;;  %v884_v31 = vmul.f32 %v3321_v54, %v3321_v54  ;;  %v3326_v38 = vld [vmem:[#allocation119_spill] sm:$0xff]  ;;  %v3336_v2 = vld [vmem:[#allocation128_spill] sm:$0xff] }
  0xb6   : > { %v1161_v35 = vadd.f32 %v1160_v55, %v888_v11  ;;  %v1150_v6 = vadd.f32 %v879_v18, %v878_v22  ;;  %v899_v58 = vmul.f32 %v3322_v27, %v3322_v27  ;;  %v900_v29 = vmul.f32 %v3323_v62, %v3323_v62  ;;  %v3331_v11 = vld [vmem:[#allocation121_spill] sm:$0xff]  ;;  %v3332_v39 = vld [vmem:[#allocation123_spill] sm:$0xff]  ;;  %v3338_v62 = vld [vmem:[#allocation130_spill] sm:$0xff] }
  0xb7   : > { %1148 = vadd.xlane.f32.xlu1 %v1147_v5  ;;  %v1136_v24 = vadd.f32 %v1135_v45, %v869_v17  ;;  %v1164_v4 = vsel %vm393_vm0, %v891_v47, 0.0  ;;  %v882_v60 = vmul.f32 %v2179_v34, %v2179_v34  ;;  %v901_v19 = vmul.f32 %v3324_v20, %v3324_v20  ;;  %v3333_v47 = vld [vmem:[#allocation129_spill] sm:$0xff]  ;;  %v424_v20 = vpop.xlane.xlu1 %423 }
  0xb8   : > { %v1162_v41 = vadd.f32 %v1161_v35, %v889_v52  ;;  %v883_v57 = vmul.f32 %v2204_v49, %v2204_v49  ;;  %v1151_v48 = vadd.f32 %v1150_v6, %v880_v28  ;;  %v1155_v8 = vsel %vm393_vm0, %v884_v31, 0.0  ;;  %v3329_v49 = vld [vmem:[#allocation122_spill] sm:$0xff]  ;;  %v3334_v52 = vld [vmem:[#allocation124_spill] sm:$0xff]  ;;  %v3335_v55 = vld [vmem:[#allocation125_spill] sm:$0xff]  ;;  %v2708_v28 = vpop.xlane.xlu0 %396  ;;  %681 = vst.msk [vmem:[%s2764_s19 + $0x18] sm:$0xff] %vm677_vm1, %v424_v20 }
  0xb9   : > { %v1138_v40 = vadd.f32 %v1137_v36, %v1136_v24  ;;  %v902_v50 = vmul.f32 %v3325_v3, %v3325_v3  ;;  %v1177_v0 = vadd.f32 %v900_v29, %v899_v58  ;;  %v892_v13 = vmul.f32 %v3326_v38, %v3326_v38  ;;  %v3330_v36 = vld [vmem:[#allocation126_spill] sm:$0xff]  ;;  %v3337_v31 = vld [vmem:[#allocation127_spill] sm:$0xff]  ;;  %678 = vst.msk [vmem:[%s2764_s19] sm:$0xff] %vm677_vm1, %v2708_v28 }
  0xba   : > { %v1163_v43 = vadd.f32 %v1162_v41, %v890_v26  ;;  %v1152_v34 = vadd.f32 %v1151_v48, %v881_v46  ;;  %v905_v42 = vmul.f32 %v3327_v59, %v3327_v59  ;;  %v893_v17 = vmul.f32 %v3328_v61, %v3328_v61  ;;  %v3340_v48 = vld [vmem:[#allocation133_spill] sm:$0xff] }
  0xbb   : > { %1139 = vadd.xlane.f32.xlu0 %v1138_v40  ;;  %v903_v32 = vmul.f32 %v3329_v49, %v3329_v49  ;;  %v904_v30 = vmul.f32 %v3330_v36, %v3330_v36  ;;  %v1178_v12 = vadd.f32 %v1177_v0, %v901_v19  ;;  %v894_v1 = vmul.f32 %v3331_v11, %v3331_v11  ;;  %v3342_v0 = vld [vmem:[#allocation134_spill] sm:$0xff] }
  0xbc   : > { %v1165_v22 = vadd.f32 %v1164_v4, %v1163_v43  ;;  %v1153_v63 = vadd.f32 %v1152_v34, %v882_v60  ;;  %v895_v44 = vmul.f32 %v3332_v39, %v3332_v39  ;;  %v898_v21 = vmul.f32 %v3333_v47, %v3333_v47  ;;  %v3339_v4 = vld [vmem:[#allocation131_spill] sm:$0xff] }
  0xbd   : > { %v1179_v18 = vadd.f32 %v1178_v12, %v902_v50  ;;  %v1168_v14 = vadd.f32 %v893_v17, %v892_v13  ;;  %v913_v26 = vmul.f32 %v3334_v52, %v3334_v52  ;;  %v914_v53 = vmul.f32 %v3335_v55, %v3335_v55  ;;  %v406_v13 = vpop.xlane.xlu0 %405 }
  0xbe   : > { %1166 = vadd.xlane.f32.xlu1 %v1165_v22  ;;  %v1154_v5 = vadd.f32 %v1153_v63, %v883_v57  ;;  %v1182_v45 = vsel %vm393_vm0, %v905_v42, 0.0  ;;  %v915_v46 = vmul.f32 %v3336_v2, %v3336_v2  ;;  %v896_v35 = vmul.f32 %v3337_v31, %v3337_v31  ;;  %v3346_v63 = vld [vmem:[#allocation138_spill] sm:$0xff]  ;;  %679 = vst.msk [vmem:[%s2764_s19 + $0x8] sm:$0xff] %vm677_vm1, %v406_v13 }
  0xbf   : > { %v1180_v54 = vadd.f32 %v1179_v18, %v903_v32  ;;  %v897_v6 = vmul.f32 %v2271_v37, %v2271_v37  ;;  %v1169_v27 = vadd.f32 %v1168_v14, %v894_v1  ;;  %v916_v29 = vmul.f32 %v3338_v62, %v3338_v62  ;;  %v3344_v32 = vld [vmem:[#allocation136_spill] sm:$0xff]  ;;  %v3345_v1 = vld [vmem:[#allocation137_spill] sm:$0xff]  ;;  %v3347_v14 = vld [vmem:[#allocation139_spill] sm:$0xff] }
  0xc0   : > { %v1156_v58 = vadd.f32 %v1155_v8, %v1154_v5  ;;  %v1195_v24 = vadd.f32 %v914_v53, %v913_v26  ;;  %v906_v60 = vmul.f32 %v3339_v4, %v3339_v4  ;;  %v1173_v57 = vsel %vm393_vm0, %v898_v21, 0.0  ;;  %v3341_v8 = vld [vmem:[#allocation132_spill] sm:$0xff]  ;;  %v3350_v31 = vld [vmem:[#allocation142_spill] sm:$0xff]  ;;  %v3351_v62 = vld [vmem:[#allocation141_spill] sm:$0xff] }
  0xc1   : > { %v1181_v19 = vadd.f32 %v1180_v54, %v904_v30  ;;  %v1170_v41 = vadd.f32 %v1169_v27, %v895_v44  ;;  %v907_v40 = vmul.f32 %v3340_v48, %v3340_v48  ;;  %v917_v37 = vmul.f32 %v2274_v33, %v2274_v33  ;;  %v3343_v33 = vld [vmem:[#allocation135_spill] sm:$0xff]  ;;  %v442_v30 = vpop.xlane.xlu1 %441  ;;  %v433_v52 = vpop.xlane.xlu0 %432  ;;  %v3348_v5 = vld [vmem:[#allocation140_spill] sm:$0xff] }
  0xc2   : > { %1157 = vadd.xlane.f32.xlu0 %v1156_v58  ;;  %v919_v3 = vmul.f32 %v3341_v8, %v3341_v8  ;;  %v1196_v50 = vadd.f32 %v1195_v24, %v915_v46  ;;  %v908_v38 = vmul.f32 %v3342_v0, %v3342_v0  ;;  %v918_v59 = vmul.f32 %v2298_v16, %v2298_v16  ;;  %v3349_v46 = vld [vmem:[#allocation143_spill] sm:$0xff]  ;;  %v3352_v4 = vld [vmem:[#allocation144_spill] sm:$0xff] }
  0xc3   : > { %v1183_v43 = vadd.f32 %v1182_v45, %v1181_v19  ;;  %v1171_v34 = vadd.f32 %v1170_v41, %v896_v35  ;;  %v909_v42 = vmul.f32 %v2277_v15, %v2277_v15  ;;  %v1186_v17 = vadd.f32 %v907_v40, %v906_v60  ;;  %683 = vst.msk [vmem:[%s2764_s19 + $0x28] sm:$0xff] %vm677_vm1, %v442_v30  ;;  %v3353_v40 = vld [vmem:[#allocation145_spill] sm:$0xff] }
  0xc4   : > { %v1197_v61 = vadd.f32 %v1196_v50, %v916_v29  ;;  %v927_v49 = vmul.f32 %v3343_v33, %v3343_v33  ;;  %v928_v36 = vmul.f32 %v3344_v32, %v3344_v32  ;;  %v912_v11 = vmul.f32 %v2306_v23, %v2306_v23  ;;  %682 = vst.msk [vmem:[%s2764_s19 + $0x20] sm:$0xff] %vm677_vm1, %v433_v52 }
  0xc5   : > { %1184 = vadd.xlane.f32.xlu1 %v1183_v43  ;;  %v1172_v12 = vadd.f32 %v1171_v34, %v897_v6  ;;  %v929_v16 = vmul.f32 %v3345_v1, %v3345_v1  ;;  %v1200_v15 = vsel %vm393_vm0, %v919_v3, 0.0  ;;  %v910_v39 = vmul.f32 %v3346_v63, %v3346_v63  ;;  %v451_v41 = vpop.xlane.xlu0 %450 }
  0xc6   : > { %v1198_v22 = vadd.f32 %v1197_v61, %v917_v37  ;;  %v1187_v44 = vadd.f32 %v1186_v17, %v908_v38  ;;  %v930_v21 = vmul.f32 %v2314_v56, %v2314_v56  ;;  %v1213_v18 = vadd.f32 %v928_v36, %v927_v49  ;;  %684 = vst.msk [vmem:[%s2764_s19 + $0x30] sm:$0xff] %vm677_vm1, %v451_v41 }
  0xc7   : > { %v1174_v47 = vadd.f32 %v1173_v57, %v1172_v12  ;;  %v920_v23 = vmul.f32 %v3347_v14, %v3347_v14  ;;  %v911_v55 = vmul.f32 %v2337_v9, %v2337_v9  ;;  %v921_v45 = vmul.f32 %v3348_v5, %v3348_v5  ;;  %v460_v9 = vpop.xlane.xlu1 %459 }
  0xc8   : > { %v1199_v26 = vadd.f32 %v1198_v22, %v918_v59  ;;  %v1188_v53 = vadd.f32 %v1187_v44, %v909_v42  ;;  %v1191_v2 = vsel %vm393_vm0, %v912_v11, 0.0  ;;  %v931_v54 = vmul.f32 %v3349_v46, %v3349_v46  ;;  %685 = vst.msk [vmem:[%s2764_s19 + $0x38] sm:$0xff] %vm677_vm1, %v460_v9 }
  0xc9   : > { %1175 = vadd.xlane.f32.xlu0 %v1174_v47  ;;  %v1214_v56 = vadd.f32 %v1213_v18, %v929_v16  ;;  %v922_v35 = vmul.f32 %v3350_v31, %v3350_v31  ;;  %v932_v58 = vmul.f32 %v2353_v51, %v2353_v51  ;;  %v933_v29 = vmul.f32 %v3351_v62, %v3351_v62 }
  0xca   : > { %v1201_v6 = vadd.f32 %v1200_v15, %v1199_v26  ;;  %v1189_v27 = vadd.f32 %v1188_v53, %v910_v39  ;;  %v923_v60 = vmul.f32 %v3352_v4, %v3352_v4  ;;  %v1204_v19 = vadd.f32 %v921_v45, %v920_v23 }
  0xcb   : > { %v1215_v24 = vadd.f32 %v1214_v56, %v930_v21  ;;  %v924_v10 = vmul.f32 %v2358_v7, %v2358_v7  ;;  %v1218_v20 = vsel %vm393_vm0, %v933_v29, 0.0  ;;  %v926_v37 = vmul.f32 %v3353_v40, %v3353_v40  ;;  %v478_v8 = vpop.xlane.xlu1 %477  ;;  %v469_v7 = vpop.xlane.xlu0 %468 }
  0xcc   : > { %1202 = vadd.xlane.f32.xlu1 %v1201_v6  ;;  %v1190_v57 = vadd.f32 %v1189_v27, %v911_v55  ;;  %v1205_v48 = vadd.f32 %v1204_v19, %v922_v35  ;;  %v925_v50 = vmul.f32 %v2371_v25, %v2371_v25  ;;  %687 = vst.msk [vmem:[%s2764_s19 + $0x48] sm:$0xff] %vm677_vm1, %v478_v8  ;;  %686 = vst.msk [vmem:[%s2764_s19 + $0x40] sm:$0xff] %vm677_vm1, %v469_v7 }
  0xcd   : > { %v1216_v51 = vadd.f32 %v1215_v24, %v931_v54  ;;  %v1209_v43 = vsel %vm393_vm0, %v926_v37, 0.0 }
  0xce   : > { %v1192_v28 = vadd.f32 %v1191_v2, %v1190_v57  ;;  %v1206_v0 = vadd.f32 %v1205_v48, %v923_v60 }
  0xcf   : > { %v1217_v3 = vadd.f32 %v1216_v51, %v932_v58  ;;  %v496_v34 = vpop.xlane.xlu1 %495  ;;  %v487_v42 = vpop.xlane.xlu0 %486 }
  0xd0   : > { %1193 = vadd.xlane.f32.xlu0 %v1192_v28  ;;  %v1207_v13 = vadd.f32 %v1206_v0, %v924_v10  ;;  %689 = vst.msk [vmem:[%s2764_s19 + $0x58] sm:$0xff] %vm677_vm1, %v496_v34  ;;  %688 = vst.msk [vmem:[%s2764_s19 + $0x50] sm:$0xff] %vm677_vm1, %v487_v42 }
  0xd1   : > { %v1219_v38 = vadd.f32 %v1218_v20, %v1217_v3 }
  0xd2   : > { %v1208_v59 = vadd.f32 %v1207_v13, %v925_v50 }
  0xd3   : > { %1220 = vadd.xlane.f32.xlu1 %v1219_v38  ;;  %v514_v61 = vpop.xlane.xlu1 %513  ;;  %v505_v17 = vpop.xlane.xlu0 %504 }
  0xd4   : > { %v1210_v25 = vadd.f32 %v1209_v43, %v1208_v59  ;;  %691 = vst.msk [vmem:[%s2764_s19 + $0x68] sm:$0xff] %vm677_vm1, %v514_v61  ;;  %690 = vst.msk [vmem:[%s2764_s19 + $0x60] sm:$0xff] %vm677_vm1, %v505_v17 }
  0xd6   : > { %1211 = vadd.xlane.f32.xlu0 %v1210_v25 }
  0xd7   : > { %v532_v33 = vpop.xlane.xlu1 %531  ;;  %v523_v49 = vpop.xlane.xlu0 %522 }
  0xd8   : > { %693 = vst.msk [vmem:[%s2764_s19 + $0x78] sm:$0xff] %vm677_vm1, %v532_v33  ;;  %692 = vst.msk [vmem:[%s2764_s19 + $0x70] sm:$0xff] %vm677_vm1, %v523_v49 }
  0xdb   : > { %v550_v32 = vpop.xlane.xlu1 %549  ;;  %v541_v36 = vpop.xlane.xlu0 %540 }
  0xdc   : > { %695 = vst.msk [vmem:[%s2764_s19 + $0x88] sm:$0xff] %vm677_vm1, %v550_v32  ;;  %694 = vst.msk [vmem:[%s2764_s19 + $0x80] sm:$0xff] %vm677_vm1, %v541_v36 }
  0xdf   : > { %v568_v30 = vpop.xlane.xlu1 %567  ;;  %v559_v12 = vpop.xlane.xlu0 %558 }
  0xe0   : > { %697 = vst.msk [vmem:[%s2764_s19 + $0x98] sm:$0xff] %vm677_vm1, %v568_v30  ;;  %696 = vst.msk [vmem:[%s2764_s19 + $0x90] sm:$0xff] %vm677_vm1, %v559_v12 }
  0xe3   : > { %v586_v11 = vpop.xlane.xlu1 %585 }
  0xe4   : > { %699 = vst.msk [vmem:[%s2764_s19 + $0xa8] sm:$0xff] %vm677_vm1, %v586_v11 }
  0xe5   : > { %v577_v1 = vpop.xlane.xlu0 %576 }
  0xe6   : > { %698 = vst.msk [vmem:[%s2764_s19 + $0xa0] sm:$0xff] %vm677_vm1, %v577_v1 }
  0xe7   : > { %v604_v16 = vpop.xlane.xlu1 %603 }
  0xe8   : > { %701 = vst.msk [vmem:[%s2764_s19 + $0xb8] sm:$0xff] %vm677_vm1, %v604_v16 }
  0xec   : > { %v595_v22 = vpop.xlane.xlu0 %594 }
  0xed   : > { %700 = vst.msk [vmem:[%s2764_s19 + $0xb0] sm:$0xff] %vm677_vm1, %v595_v22 }
  0xee   : > { %v622_v15 = vpop.xlane.xlu1 %621 }
  0xef   : > { %703 = vst.msk [vmem:[%s2764_s19 + $0xc8] sm:$0xff] %vm677_vm1, %v622_v15 }
  0xf2   : > { %v613_v63 = vpop.xlane.xlu0 %612 }
  0xf3   : > { %702 = vst.msk [vmem:[%s2764_s19 + $0xc0] sm:$0xff] %vm677_vm1, %v613_v63 }
  0xf5   : > { %v640_v39 = vpop.xlane.xlu1 %639 }
  0xf6   : > { %705 = vst.msk [vmem:[%s2764_s19 + $0xd8] sm:$0xff] %vm677_vm1, %v640_v39 }
  0xf7   : > { %v631_v44 = vpop.xlane.xlu0 %630 }
  0xf8   : > { %704 = vst.msk [vmem:[%s2764_s19 + $0xd0] sm:$0xff] %vm677_vm1, %v631_v44 }
  0xfb   : > { %v658_v47 = vpop.xlane.xlu1 %657 }
  0xfc   : > { %707 = vst.msk [vmem:[%s2764_s19 + $0xe8] sm:$0xff] %vm677_vm1, %v658_v47 }
  0xff   : > { %v649_v21 = vpop.xlane.xlu0 %648 }
 0x100   : > { %706 = vst.msk [vmem:[%s2764_s19 + $0xe0] sm:$0xff] %vm677_vm1, %v649_v21  ;;  %v676_v18 = vpop.xlane.xlu1 %675 }
 0x101   : > { %709 = vst.msk [vmem:[%s2764_s19 + $0xf8] sm:$0xff] %vm677_vm1, %v676_v18 }
 0x104   : > { %v667_v14 = vpop.xlane.xlu0 %666  ;;  %v951_v23 = vpop.xlane.xlu1 %950 }
 0x105   : > { %708 = vst.msk [vmem:[%s2764_s19 + $0xf0] sm:$0xff] %vm677_vm1, %v667_v14  ;;  %1223 = vst.msk [vmem:[%s2849_s22 + $0x8] sm:$0xff] %vm677_vm1, %v951_v23 }
 0x108   : > { %v942_v52 = vpop.xlane.xlu0 %941  ;;  %v969_v26 = vpop.xlane.xlu1 %968 }
 0x109   : > { %1222 = vst.msk [vmem:[%s2849_s22] sm:$0xff] %vm677_vm1, %v942_v52  ;;  %1225 = vst.msk [vmem:[%s2849_s22 + $0x18] sm:$0xff] %vm677_vm1, %v969_v26 }
 0x10c   : > { %v960_v55 = vpop.xlane.xlu0 %959  ;;  %v987_v53 = vpop.xlane.xlu1 %986 }
 0x10d   : > { %1224 = vst.msk [vmem:[%s2849_s22 + $0x10] sm:$0xff] %vm677_vm1, %v960_v55  ;;  %1227 = vst.msk [vmem:[%s2849_s22 + $0x28] sm:$0xff] %vm677_vm1, %v987_v53 }
 0x110   : > { %v978_v5 = vpop.xlane.xlu0 %977  ;;  %v1005_v45 = vpop.xlane.xlu1 %1004 }
 0x111   : > { %1226 = vst.msk [vmem:[%s2849_s22 + $0x20] sm:$0xff] %vm677_vm1, %v978_v5  ;;  %1229 = vst.msk [vmem:[%s2849_s22 + $0x38] sm:$0xff] %vm677_vm1, %v1005_v45 }
 0x114   : > { %v996_v2 = vpop.xlane.xlu0 %995  ;;  %v1023_v46 = vpop.xlane.xlu1 %1022 }
 0x115   : > { %1228 = vst.msk [vmem:[%s2849_s22 + $0x30] sm:$0xff] %vm677_vm1, %v996_v2  ;;  %1231 = vst.msk [vmem:[%s2849_s22 + $0x48] sm:$0xff] %vm677_vm1, %v1023_v46 }
 0x118   : > { %v1014_v54 = vpop.xlane.xlu0 %1013  ;;  %v1041_v56 = vpop.xlane.xlu1 %1040 }
 0x119   : > { %1230 = vst.msk [vmem:[%s2849_s22 + $0x40] sm:$0xff] %vm677_vm1, %v1014_v54  ;;  %1233 = vst.msk [vmem:[%s2849_s22 + $0x58] sm:$0xff] %vm677_vm1, %v1041_v56 }
 0x11c   : > { %v1032_v31 = vpop.xlane.xlu0 %1031 }
 0x11d   : > { %1232 = vst.msk [vmem:[%s2849_s22 + $0x50] sm:$0xff] %vm677_vm1, %v1032_v31  ;;  %v1059_v35 = vpop.xlane.xlu1 %1058 }
 0x11e   : > { %1235 = vst.msk [vmem:[%s2849_s22 + $0x68] sm:$0xff] %vm677_vm1, %v1059_v35 }
 0x121   : > { %v1050_v9 = vpop.xlane.xlu0 %1049 }
 0x122   : > { %1234 = vst.msk [vmem:[%s2849_s22 + $0x60] sm:$0xff] %vm677_vm1, %v1050_v9 }
 0x124   : > { %v1077_v6 = vpop.xlane.xlu1 %1076 }
 0x125   : > { %1237 = vst.msk [vmem:[%s2849_s22 + $0x78] sm:$0xff] %vm677_vm1, %v1077_v6 }
 0x128   : > { %v1068_v27 = vpop.xlane.xlu0 %1067 }
 0x129   : > { %1236 = vst.msk [vmem:[%s2849_s22 + $0x70] sm:$0xff] %vm677_vm1, %v1068_v27 }
 0x12b   : > { %v1095_v58 = vpop.xlane.xlu1 %1094 }
 0x12c   : > { %1239 = vst.msk [vmem:[%s2849_s22 + $0x88] sm:$0xff] %vm677_vm1, %v1095_v58 }
 0x12f   : > { %v1086_v62 = vpop.xlane.xlu0 %1085 }
 0x130   : > { %1238 = vst.msk [vmem:[%s2849_s22 + $0x80] sm:$0xff] %vm677_vm1, %v1086_v62 }
 0x132   : > { %v1113_v29 = vpop.xlane.xlu1 %1112 }
 0x133   : > { %1241 = vst.msk [vmem:[%s2849_s22 + $0x98] sm:$0xff] %vm677_vm1, %v1113_v29 }
 0x136   : > { %v1104_v24 = vpop.xlane.xlu0 %1103 }
 0x137   : > { %1240 = vst.msk [vmem:[%s2849_s22 + $0x90] sm:$0xff] %vm677_vm1, %v1104_v24 }
 0x139   : > { %v1131_v4 = vpop.xlane.xlu1 %1130 }
 0x13a   : > { %1243 = vst.msk [vmem:[%s2849_s22 + $0xa8] sm:$0xff] %vm677_vm1, %v1131_v4 }
 0x13d   : > { %v1122_v60 = vpop.xlane.xlu0 %1121 }
 0x13e   : > { %1242 = vst.msk [vmem:[%s2849_s22 + $0xa0] sm:$0xff] %vm677_vm1, %v1122_v60 }
 0x140   : > { %v1149_v19 = vpop.xlane.xlu1 %1148 }
 0x141   : > { %1245 = vst.msk [vmem:[%s2849_s22 + $0xb8] sm:$0xff] %vm677_vm1, %v1149_v19 }
 0x144   : > { %v1140_v41 = vpop.xlane.xlu0 %1139 }
 0x145   : > { %1244 = vst.msk [vmem:[%s2849_s22 + $0xb0] sm:$0xff] %vm677_vm1, %v1140_v41 }
 0x147   : > { %v1167_v57 = vpop.xlane.xlu1 %1166 }
 0x148   : > { %1247 = vst.msk [vmem:[%s2849_s22 + $0xc8] sm:$0xff] %vm677_vm1, %v1167_v57 }
 0x14b   : > { %v1158_v51 = vpop.xlane.xlu0 %1157 }
 0x14c   : > { %1246 = vst.msk [vmem:[%s2849_s22 + $0xc0] sm:$0xff] %vm677_vm1, %v1158_v51 }
 0x14e   : > { %v1185_v10 = vpop.xlane.xlu1 %1184 }
 0x14f   : > { %1249 = vst.msk [vmem:[%s2849_s22 + $0xd8] sm:$0xff] %vm677_vm1, %v1185_v10 }
 0x152   : > { %v1176_v48 = vpop.xlane.xlu0 %1175 }
 0x153   : > { %1248 = vst.msk [vmem:[%s2849_s22 + $0xd0] sm:$0xff] %vm677_vm1, %v1176_v48 }
 0x155   : > { %v1203_v28 = vpop.xlane.xlu1 %1202 }
 0x156   : > { %1251 = vst.msk [vmem:[%s2849_s22 + $0xe8] sm:$0xff] %vm677_vm1, %v1203_v28 }
 0x159   : > { %v1194_v20 = vpop.xlane.xlu0 %1193 }
 0x15a   : > { %1250 = vst.msk [vmem:[%s2849_s22 + $0xe0] sm:$0xff] %vm677_vm1, %v1194_v20 }
 0x15c   : > { %v1221_v40 = vpop.xlane.xlu1 %1220 }
 0x15d   : > { %1253 = vst.msk [vmem:[%s2849_s22 + $0xf8] sm:$0xff] %vm677_vm1, %v1221_v40 }
 0x15f   : > { %v1212_v37 = vpop.xlane.xlu0 %1211 }
 0x160   : > { %1252 = vst.msk [vmem:[%s2849_s22 + $0xf0] sm:$0xff] %vm677_vm1, %v1212_v37 }
 0x161 PF: > { %s13_s9 = sadd.s32 1, %s1372_s9  }
 0x162   : > { %p10_p4 = scmp.ge.s32.totalorder %s13_s9, 4  }
 0x164   :  { %12 = sbr.rel (!%p10_p4) target bundleno = 1 (0x1), region = 66 }

</bundles_post_ra>
